<compile_context>
chip_gen: v7x
topology: tpu7x:2x2x1
jax: 0.10.0
libtpu: 0.0.40
codegen_flags: <defaults>
</compile_context>

<pallas_src>
import jax
import jax.numpy as jnp
from jax.experimental import pallas as pl
from jax.experimental.pallas import tpu as pltpu

# ---- module-consistent configuration ----------------------------------------
N_PER_GRAPH = 16               # nodes per graph
GRAPHS_PER_GROUP = 8           # graphs packed per 128-node group
MG = GRAPHS_PER_GROUP * N_PER_GRAPH      # 128 nodes per grid step
NUM_GROUPS = 4                 # grid length (packed-graph super-batches)
TOTAL_NODES = NUM_GROUPS * MG            # 512
TOTAL_GRAPHS = NUM_GROUPS * GRAPHS_PER_GROUP   # 32
INPUT_DIM = 8                  # input_dim
HIDDEN = 32                    # hidden_dim
LAYERS_PRE_MP = 2              # layers_pre_mp (Linear->ReLU stack)
LAYERS_MP = 2                  # layers_mp
HOPS = 3                       # hops == max_path_length
DROPOUT = 0.1                  # identity at inference
HCAT = HOPS * HIDDEN           # 96 : lane-concatenated per-hop width
LANE = 128                     # lane-padded MLP width (96 -> 128)
# concat_hidden=False, readout='sum'


def wlgnn_kernel(x_ref,                         # VMEM (MG, INPUT_DIM)      streamed
                 ahat_ref,                      # VMEM (HOPS*MG, MG) bf16   streamed
                 seg_ref,                       # VMEM (GPG, MG)            resident
                 wpre0_ref, bpre0_ref,          # VMEM (IN, H), (1, H)
                 wpre1_ref, bpre1_ref,          # VMEM (H, H), (1, H)
                 eps_ref,                       # VMEM (L, 1, H)
                 w1pad_ref, b1pad_ref,          # VMEM (L, 128, 128), (L, 1, 128)
                 w2st_ref, b2sum_ref,           # VMEM (L, 128, H),  (L, 1, H)
                 node_ref, graph_ref,           # VMEM (MG, H), (GPG, H)
                 agg_ref):                      # VMEM scratch (MG, 128)
    f32 = jnp.float32

    # --- pre_mp: stacked Linear -> ReLU (biases broadcast in-kernel) --------
    h = jnp.dot(x_ref[...], wpre0_ref[...], preferred_element_type=f32) + bpre0_ref[...]
    h = jnp.maximum(h, 0.0)
    h = jnp.dot(h, wpre1_ref[...], preferred_element_type=f32) + bpre1_ref[...]
    x = jnp.maximum(h, 0.0)

    # zero the lane-padding of the aggregation scratch (matching w1pad rows
    # are zero, but uninitialized VMEM could hold NaNs -> 0*NaN poison).
    agg_ref[:, HCAT:] = jnp.zeros((MG, LANE - HCAT), f32)

    # bf16 in HBM (small integer counts, exact); upcast once for f32 matmuls.
    ahat = ahat_ref[...].astype(f32)

    # --- WL message-passing layers (static -> unrolled) ---------------------
    for l in range(LAYERS_MP):
        # all hop aggregations in one matmul:  agg_hop = (I + A_hop) @ x
        agg_stk = jnp.dot(ahat, x, preferred_element_type=f32)        # (HOPS*MG, H)
        # place the hop slabs at static lane offsets 0/32/64 in the
        # lane-padded scratch (no jnp.concatenate / lane relayout)
        for hop in range(HOPS):
            agg_ref[:, hop * HIDDEN:(hop + 1) * HIDDEN] = agg_stk[hop * MG:(hop + 1) * MG, :]
        # fused per-hop MLP layer 1: block-diagonal (128,128) weight, K=N=128
        t = jnp.dot(agg_ref[...], w1pad_ref[l], preferred_element_type=f32) + b1pad_ref[l]
        t = jnp.maximum(t, 0.0)
        # fused per-hop MLP layer 2 + hop-sum: row-stacked W2 (K padded to 128)
        x = ((1.0 + eps_ref[l]) * x
             + jnp.dot(t, w2st_ref[l], preferred_element_type=f32)
             + b2sum_ref[l])
        # dropout: identity at inference

    node_ref[...] = x
    # SumReadout per packed graph: segment-matrix matmul -> (GPG, H)
    graph_ref[...] = jnp.dot(seg_ref[...], x, preferred_element_type=f32)


def local_wl_gnn_forward(x, ahat, seg, wpre0, bpre0, wpre1, bpre1,
                         eps_row, w1pad, b1pad, w2st, b2sum):
    num_groups = ahat.shape[0]
    grid_spec = pltpu.PrefetchScalarGridSpec(
        num_scalar_prefetch=0,
        grid=(num_groups,),
        in_specs=[
            # streamed per-group inputs
            pl.BlockSpec((MG, INPUT_DIM), lambda g: (g, 0)),               # x
            pl.BlockSpec((None, HOPS * MG, MG), lambda g: (g, 0, 0)),      # ahat (bf16)
            # shared / resident inputs (constant block index -> no re-DMA)
            pl.BlockSpec((GRAPHS_PER_GROUP, MG), lambda g: (0, 0)),        # seg
            pl.BlockSpec((INPUT_DIM, HIDDEN), lambda g: (0, 0)),           # wpre0
            pl.BlockSpec((1, HIDDEN), lambda g: (0, 0)),                   # bpre0
            pl.BlockSpec((HIDDEN, HIDDEN), lambda g: (0, 0)),              # wpre1
            pl.BlockSpec((1, HIDDEN), lambda g: (0, 0)),                   # bpre1
            pl.BlockSpec((LAYERS_MP, 1, HIDDEN), lambda g: (0, 0, 0)),     # eps rows
            pl.BlockSpec((LAYERS_MP, LANE, LANE), lambda g: (0, 0, 0)),    # w1 block-diag pad
            pl.BlockSpec((LAYERS_MP, 1, LANE), lambda g: (0, 0, 0)),       # b1 lane-cat pad
            pl.BlockSpec((LAYERS_MP, LANE, HIDDEN), lambda g: (0, 0, 0)),  # w2 row-stacked
            pl.BlockSpec((LAYERS_MP, 1, HIDDEN), lambda g: (0, 0, 0)),     # b2 hop-summed
        ],
        out_specs=(
            pl.BlockSpec((MG, HIDDEN), lambda g: (g, 0)),                  # node features
            pl.BlockSpec((GRAPHS_PER_GROUP, HIDDEN), lambda g: (g, 0)),    # graph features
        ),
        scratch_shapes=[pltpu.VMEM((MG, LANE), jnp.float32)],
    )
    node_f, graph_f = pl.pallas_call(
        wlgnn_kernel,
        out_shape=(jax.ShapeDtypeStruct((x.shape[0], HIDDEN), jnp.float32),
                   jax.ShapeDtypeStruct((num_groups * GRAPHS_PER_GROUP, HIDDEN), jnp.float32)),
        grid_spec=grid_spec,
        compiler_params=pltpu.CompilerParams(dimension_semantics=("parallel",)),
    )(x, ahat, seg, wpre0, bpre0, wpre1, bpre1, eps_row, w1pad, b1pad, w2st, b2sum)
    return {'graph_feature': graph_f, 'node_feature': node_f}


def reference_forward(x_all, A, wpre0, bpre0, wpre1, bpre1, eps, w1, b1, w2, b2, seg):
    """Unfused plain-JAX reference mirroring the PyTorch module exactly."""
    nodes, graphs = [], []
    for g in range(NUM_GROUPS):
        x = x_all[g * MG:(g + 1) * MG]
        h = jnp.maximum(x @ wpre0 + bpre0, 0.0)
        h = jnp.maximum(h @ wpre1 + bpre1, 0.0)
        x = h
        for l in range(LAYERS_MP):
            out = (1.0 + eps[l]) * x
            for hop in range(HOPS):
                agg = x + A[g, hop] @ x     # gather + scatter_reduce(sum, include_self=True)
                t = jnp.maximum(agg @ w1[l, hop] + b1[l, hop], 0.0)
                out = out + t @ w2[l, hop] + b2[l, hop]
            x = out
        nodes.append(x)
        graphs.append(seg @ x)
    return jnp.concatenate(nodes, axis=0), jnp.concatenate(graphs, axis=0)


if __name__ == "__main__":
    key = jax.random.PRNGKey(0)
    k_scat, k_node, k_x, k0, k1, k2, k3, k4, k5, k6, k7 = jax.random.split(key, 11)

    # ---- packed-graph node features -----------------------------------------
    x = jax.random.normal(k_x, (TOTAL_NODES, INPUT_DIM), jnp.float32)

    # ---- emulate agg_scatter_index_h / agg_node_index_h per graph -----------
    # (int index arrays padded with -1), densified into per-group block-diagonal
    # per-hop adjacencies over the 128-node packed axis.
    E = 48
    scat = jax.random.randint(k_scat, (NUM_GROUPS, HOPS, GRAPHS_PER_GROUP, E), 0, N_PER_GRAPH)
    node = jax.random.randint(k_node, (NUM_GROUPS, HOPS, GRAPHS_PER_GROUP, E), 0, N_PER_GRAPH)
    pad = jnp.arange(E)[None, :] >= (E - 8 * (jnp.arange(HOPS)[:, None] + 1))   # trailing -1 pad
    valid = (~pad).astype(jnp.float32)[None, :, None, :]                        # (1,HOPS,1,E)
    oh_node = jax.nn.one_hot(node, N_PER_GRAPH, dtype=jnp.float32)              # (...,E,16)
    oh_scat = jax.nn.one_hot(scat, N_PER_GRAPH, dtype=jnp.float32)
    A_small = jnp.einsum('ghcen,ghces->ghcns', oh_node * valid[..., None], oh_scat)
    eyeC = jnp.eye(GRAPHS_PER_GROUP, dtype=jnp.float32)
    A = (A_small[:, :, :, :, None, :] * eyeC[None, None, :, None, :, None]).reshape(
        NUM_GROUPS, HOPS, MG, MG)                                               # (G,HOPS,128,128)

    # ---- deterministic parameter init (original, unfused layout) ------------
    s_in = 1.0 / jnp.sqrt(jnp.float32(INPUT_DIM))
    s_h = 1.0 / jnp.sqrt(jnp.float32(HIDDEN))
    wpre0 = s_in * jax.random.normal(k0, (INPUT_DIM, HIDDEN), jnp.float32)
    bpre0 = 0.01 * jax.random.normal(k1, (1, HIDDEN), jnp.float32)
    wpre1 = s_h * jax.random.normal(k2, (HIDDEN, HIDDEN), jnp.float32)
    bpre1 = 0.01 * jax.random.normal(k3, (1, HIDDEN), jnp.float32)
    w1 = s_h * jax.random.normal(k4, (LAYERS_MP, HOPS, HIDDEN, HIDDEN), jnp.float32)
    b1 = 0.01 * jax.random.normal(k5, (LAYERS_MP, HOPS, 1, HIDDEN), jnp.float32)
    w2 = s_h * jax.random.normal(k6, (LAYERS_MP, HOPS, HIDDEN, HIDDEN), jnp.float32)
    b2 = 0.01 * jax.random.normal(k7, (LAYERS_MP, HOPS, 1, HIDDEN), jnp.float32)
    eps = jnp.full((LAYERS_MP,), 0.1, jnp.float32)            # nn.Parameter(ones(1)*0.1)

    # ---- host-side packing into fused / lane-dense layouts ------------------
    # rowstacked (I + A_hop) per group, stored bf16 (exact small ints, half DMA)
    eyeM = jnp.eye(MG, dtype=jnp.float32)
    ahat = jnp.concatenate([eyeM[None] + A[:, hop] for hop in range(HOPS)],
                           axis=1).astype(jnp.bfloat16)                    # (G, HOPS*MG, MG)
    # block-diagonal first-layer weights, K and N lane-padded 96 -> 128
    w1pad = jnp.zeros((LAYERS_MP, LANE, LANE), jnp.float32)
    b1pad = jnp.zeros((LAYERS_MP, 1, LANE), jnp.float32)
    for l in range(LAYERS_MP):
        for hop in range(HOPS):
            sl = slice(hop * HIDDEN, (hop + 1) * HIDDEN)
            w1pad = w1pad.at[l, sl, sl].set(w1[l, hop])
            b1pad = b1pad.at[l, :, sl].set(b1[l, hop])
    # row-stacked second-layer weights (hop-sum folded into contraction), K padded to 128
    w2st = jnp.zeros((LAYERS_MP, LANE, HIDDEN), jnp.float32)
    for l in range(LAYERS_MP):
        for hop in range(HOPS):
            w2st = w2st.at[l, hop * HIDDEN:(hop + 1) * HIDDEN, :].set(w2[l, hop])
    # per-layer sum of second-layer biases, kept (L, 1, H) -> in-kernel broadcast
    b2sum = jnp.sum(b2, axis=1)                                             # (L, 1, H)
    # eps as a tiny (L, 1, H) row (VMEM, sublane-broadcast in kernel)
    eps_row = jnp.broadcast_to(eps[:, None, None], (LAYERS_MP, 1, HIDDEN)).astype(jnp.float32)
    # SumReadout segment matrix (identical for every 128-node group)
    seg = jnp.repeat(jnp.eye(GRAPHS_PER_GROUP, dtype=jnp.float32), N_PER_GRAPH, axis=1)  # (8,128)

    # ---- run kernel ----------------------------------------------------------
    out = local_wl_gnn_forward(x, ahat, seg, wpre0, bpre0, wpre1, bpre1,
                               eps_row, w1pad, b1pad, w2st, b2sum)
    node_f = jax.block_until_ready(out['node_feature'])
    graph_f = jax.block_until_ready(out['graph_feature'])

    # ---- verify against the unfused reference --------------------------------
    node_ref, graph_ref = reference_forward(x, A, wpre0, bpre0, wpre1, bpre1,
                                            eps, w1, b1, w2, b2, seg)
    assert node_f.shape == (TOTAL_NODES, HIDDEN) and graph_f.shape == (TOTAL_GRAPHS, HIDDEN)
    assert jnp.allclose(node_f, node_ref, rtol=1e-3, atol=1e-3)
    assert jnp.allclose(graph_f, graph_ref, rtol=1e-3, atol=1e-3)
    print("KERNEL_OK")
</pallas_src>

<mosaic_0001>
module attributes {stable_mosaic.version = 11 : i64} {
  func.func @wlgnn_kernel(%arg0: i32, %arg1: memref<128x8xf32, #tpu.memory_space<vmem>>, %arg2: memref<1x384x128xbf16, #tpu.memory_space<vmem>>, %arg3: memref<8x128xf32, #tpu.memory_space<vmem>>, %arg4: memref<8x32xf32, #tpu.memory_space<vmem>>, %arg5: memref<1x32xf32, #tpu.memory_space<vmem>>, %arg6: memref<32x32xf32, #tpu.memory_space<vmem>>, %arg7: memref<1x32xf32, #tpu.memory_space<vmem>>, %arg8: memref<2x1x32xf32, #tpu.memory_space<vmem>>, %arg9: memref<2x128x128xf32, #tpu.memory_space<vmem>>, %arg10: memref<2x1x128xf32, #tpu.memory_space<vmem>>, %arg11: memref<2x128x32xf32, #tpu.memory_space<vmem>>, %arg12: memref<2x1x32xf32, #tpu.memory_space<vmem>>, %arg13: memref<128x32xf32, #tpu.memory_space<vmem>>, %arg14: memref<8x32xf32, #tpu.memory_space<vmem>>, %arg15: memref<128x128xf32, #tpu.memory_space<vmem>>) attributes {dimension_semantics = [#tpu.dimension_semantics<parallel>], iteration_bounds = array<i64: 4>, scalar_prefetch = 0 : i64, scratch_operands = 1 : i64, tpu.core_type = #tpu.core_type<tc>, window_params = [{transform_indices = @transform_0, window_bounds = array<i64: 128, 8>}, {transform_indices = @transform_1, window_bounds = array<i64: 1, 384, 128>}, {pipeline_mode = #tpu.pipeline_mode<synchronous>, transform_indices = @transform_2, window_bounds = array<i64: 8, 128>}, {pipeline_mode = #tpu.pipeline_mode<synchronous>, transform_indices = @transform_3, window_bounds = array<i64: 8, 32>}, {pipeline_mode = #tpu.pipeline_mode<synchronous>, transform_indices = @transform_4, window_bounds = array<i64: 1, 32>}, {pipeline_mode = #tpu.pipeline_mode<synchronous>, transform_indices = @transform_5, window_bounds = array<i64: 32, 32>}, {pipeline_mode = #tpu.pipeline_mode<synchronous>, transform_indices = @transform_6, window_bounds = array<i64: 1, 32>}, {pipeline_mode = #tpu.pipeline_mode<synchronous>, transform_indices = @transform_7, window_bounds = array<i64: 2, 1, 32>}, {pipeline_mode = #tpu.pipeline_mode<synchronous>, transform_indices = @transform_8, window_bounds = array<i64: 2, 128, 128>}, {pipeline_mode = #tpu.pipeline_mode<synchronous>, transform_indices = @transform_9, window_bounds = array<i64: 2, 1, 128>}, {pipeline_mode = #tpu.pipeline_mode<synchronous>, transform_indices = @transform_10, window_bounds = array<i64: 2, 128, 32>}, {pipeline_mode = #tpu.pipeline_mode<synchronous>, transform_indices = @transform_11, window_bounds = array<i64: 2, 1, 32>}, {transform_indices = @transform_12, window_bounds = array<i64: 128, 32>}, {transform_indices = @transform_13, window_bounds = array<i64: 8, 32>}]} {
    %c0 = arith.constant 0 : index
    %c0_0 = arith.constant 0 : index
    %0 = vector.load %arg1[%c0, %c0_0] : memref<128x8xf32, #tpu.memory_space<vmem>>, vector<128x8xf32>
    %c0_1 = arith.constant 0 : index
    %c0_2 = arith.constant 0 : index
    %1 = vector.load %arg4[%c0_1, %c0_2] : memref<8x32xf32, #tpu.memory_space<vmem>>, vector<8x32xf32>
    %cst = arith.constant dense<0.000000e+00> : vector<128x32xf32>
    %2 = tpu.matmul %0, %1, %cst {dimension_numbers = #tpu.dot_dimension_numbers<[1], [0], [0], [1], [0, 0, 1, 1], [], []>} : vector<128x8xf32>, vector<8x32xf32>, vector<128x32xf32> -> vector<128x32xf32>
    %c0_3 = arith.constant 0 : index
    %c0_4 = arith.constant 0 : index
    %3 = vector.load %arg5[%c0_3, %c0_4] : memref<1x32xf32, #tpu.memory_space<vmem>>, vector<1x32xf32>
    %4 = vector.broadcast %3 : vector<1x32xf32> to vector<128x32xf32>
    %5 = arith.addf %2, %4 : vector<128x32xf32>
    %cst_5 = arith.constant 0.000000e+00 : f32
    %6 = vector.broadcast %cst_5 : f32 to vector<128x32xf32>
    %7 = arith.maximumf %5, %6 : vector<128x32xf32>
    %c0_6 = arith.constant 0 : index
    %c0_7 = arith.constant 0 : index
    %8 = vector.load %arg6[%c0_6, %c0_7] : memref<32x32xf32, #tpu.memory_space<vmem>>, vector<32x32xf32>
    %cst_8 = arith.constant dense<0.000000e+00> : vector<128x32xf32>
    %9 = tpu.matmul %7, %8, %cst_8 {dimension_numbers = #tpu.dot_dimension_numbers<[1], [0], [0], [1], [0, 0, 1, 1], [], []>} : vector<128x32xf32>, vector<32x32xf32>, vector<128x32xf32> -> vector<128x32xf32>
    %c0_9 = arith.constant 0 : index
    %c0_10 = arith.constant 0 : index
    %10 = vector.load %arg7[%c0_9, %c0_10] : memref<1x32xf32, #tpu.memory_space<vmem>>, vector<1x32xf32>
    %11 = vector.broadcast %10 : vector<1x32xf32> to vector<128x32xf32>
    %12 = arith.addf %9, %11 : vector<128x32xf32>
    %cst_11 = arith.constant 0.000000e+00 : f32
    %13 = vector.broadcast %cst_11 : f32 to vector<128x32xf32>
    %14 = arith.maximumf %12, %13 : vector<128x32xf32>
    %cst_12 = arith.constant 0.000000e+00 : f32
    %15 = vector.broadcast %cst_12 : f32 to vector<128x32xf32>
    %c0_13 = arith.constant 0 : index
    %c96 = arith.constant 96 : index
    %16 = vector.load %arg15[%c0_13, %c96] : memref<128x128xf32, #tpu.memory_space<vmem>>, vector<128x32xf32>
    tpu.vector_store %arg15[%c0_13, %c96], %15 {strides = array<i32>} : memref<128x128xf32, #tpu.memory_space<vmem>>, vector<128x32xf32>,
    %c0_14 = arith.constant 0 : index
    %c0_15 = arith.constant 0 : index
    %c0_16 = arith.constant 0 : index
    %17 = vector.load %arg2[%c0_14, %c0_15, %c0_16] : memref<1x384x128xbf16, #tpu.memory_space<vmem>>, vector<1x384x128xbf16>
    %18 = vector.shape_cast %17 : vector<1x384x128xbf16> to vector<384x128xbf16>
    %19 = arith.extf %18 : vector<384x128xbf16> to vector<384x128xf32>
    %cst_17 = arith.constant dense<0.000000e+00> : vector<384x32xf32>
    %20 = tpu.matmul %19, %14, %cst_17 {dimension_numbers = #tpu.dot_dimension_numbers<[1], [0], [0], [1], [0, 0, 1, 1], [], []>} : vector<384x128xf32>, vector<128x32xf32>, vector<384x32xf32> -> vector<384x32xf32>
    %21 = vector.extract_strided_slice %20 {offsets = [0, 0], sizes = [128, 32], strides = [1, 1]} : vector<384x32xf32> to vector<128x32xf32>
    %c0_18 = arith.constant 0 : index
    %c0_19 = arith.constant 0 : index
    %22 = vector.load %arg15[%c0_18, %c0_19] : memref<128x128xf32, #tpu.memory_space<vmem>>, vector<128x32xf32>
    tpu.vector_store %arg15[%c0_18, %c0_19], %21 {strides = array<i32>} : memref<128x128xf32, #tpu.memory_space<vmem>>, vector<128x32xf32>,
    %23 = vector.extract_strided_slice %20 {offsets = [128, 0], sizes = [128, 32], strides = [1, 1]} : vector<384x32xf32> to vector<128x32xf32>
    %c0_20 = arith.constant 0 : index
    %c32 = arith.constant 32 : index
    %24 = vector.load %arg15[%c0_20, %c32] : memref<128x128xf32, #tpu.memory_space<vmem>>, vector<128x32xf32>
    tpu.vector_store %arg15[%c0_20, %c32], %23 {strides = array<i32>} : memref<128x128xf32, #tpu.memory_space<vmem>>, vector<128x32xf32>,
    %25 = vector.extract_strided_slice %20 {offsets = [256, 0], sizes = [128, 32], strides = [1, 1]} : vector<384x32xf32> to vector<128x32xf32>
    %c0_21 = arith.constant 0 : index
    %c64 = arith.constant 64 : index
    %26 = vector.load %arg15[%c0_21, %c64] : memref<128x128xf32, #tpu.memory_space<vmem>>, vector<128x32xf32>
    tpu.vector_store %arg15[%c0_21, %c64], %25 {strides = array<i32>} : memref<128x128xf32, #tpu.memory_space<vmem>>, vector<128x32xf32>,
    %c0_22 = arith.constant 0 : index
    %c0_23 = arith.constant 0 : index
    %27 = vector.load %arg15[%c0_22, %c0_23] : memref<128x128xf32, #tpu.memory_space<vmem>>, vector<128x128xf32>
    %c0_24 = arith.constant 0 : index
    %c0_25 = arith.constant 0 : index
    %c0_26 = arith.constant 0 : index
    %28 = vector.load %arg9[%c0_24, %c0_25, %c0_26] : memref<2x128x128xf32, #tpu.memory_space<vmem>>, vector<1x128x128xf32>
    %29 = vector.shape_cast %28 : vector<1x128x128xf32> to vector<128x128xf32>
    %cst_27 = arith.constant dense<0.000000e+00> : vector<128x128xf32>
    %30 = tpu.matmul %27, %29, %cst_27 {dimension_numbers = #tpu.dot_dimension_numbers<[1], [0], [0], [1], [0, 0, 1, 1], [], []>} : vector<128x128xf32>, vector<128x128xf32>, vector<128x128xf32> -> vector<128x128xf32>
    %c0_28 = arith.constant 0 : index
    %c0_29 = arith.constant 0 : index
    %c0_30 = arith.constant 0 : index
    %31 = vector.load %arg10[%c0_28, %c0_29, %c0_30] : memref<2x1x128xf32, #tpu.memory_space<vmem>>, vector<1x1x128xf32>
    %32 = vector.shape_cast %31 : vector<1x1x128xf32> to vector<1x128xf32>
    %33 = vector.broadcast %32 : vector<1x128xf32> to vector<128x128xf32>
    %34 = arith.addf %30, %33 : vector<128x128xf32>
    %cst_31 = arith.constant 0.000000e+00 : f32
    %35 = vector.broadcast %cst_31 : f32 to vector<128x128xf32>
    %36 = arith.maximumf %34, %35 : vector<128x128xf32>
    %c0_32 = arith.constant 0 : index
    %c0_33 = arith.constant 0 : index
    %c0_34 = arith.constant 0 : index
    %37 = vector.load %arg8[%c0_32, %c0_33, %c0_34] : memref<2x1x32xf32, #tpu.memory_space<vmem>>, vector<1x1x32xf32>
    %38 = vector.shape_cast %37 : vector<1x1x32xf32> to vector<1x32xf32>
    %cst_35 = arith.constant 1.000000e+00 : f32
    %39 = vector.broadcast %cst_35 : f32 to vector<1x32xf32>
    %40 = arith.addf %39, %38 : vector<1x32xf32>
    %41 = vector.broadcast %40 : vector<1x32xf32> to vector<128x32xf32>
    %42 = arith.mulf %41, %14 : vector<128x32xf32>
    %c0_36 = arith.constant 0 : index
    %c0_37 = arith.constant 0 : index
    %c0_38 = arith.constant 0 : index
    %43 = vector.load %arg11[%c0_36, %c0_37, %c0_38] : memref<2x128x32xf32, #tpu.memory_space<vmem>>, vector<1x128x32xf32>
    %44 = vector.shape_cast %43 : vector<1x128x32xf32> to vector<128x32xf32>
    %cst_39 = arith.constant dense<0.000000e+00> : vector<128x32xf32>
    %45 = tpu.matmul %36, %44, %cst_39 {dimension_numbers = #tpu.dot_dimension_numbers<[1], [0], [0], [1], [0, 0, 1, 1], [], []>} : vector<128x128xf32>, vector<128x32xf32>, vector<128x32xf32> -> vector<128x32xf32>
    %46 = arith.addf %42, %45 : vector<128x32xf32>
    %c0_40 = arith.constant 0 : index
    %c0_41 = arith.constant 0 : index
    %c0_42 = arith.constant 0 : index
    %47 = vector.load %arg12[%c0_40, %c0_41, %c0_42] : memref<2x1x32xf32, #tpu.memory_space<vmem>>, vector<1x1x32xf32>
    %48 = vector.shape_cast %47 : vector<1x1x32xf32> to vector<1x32xf32>
    %49 = vector.broadcast %48 : vector<1x32xf32> to vector<128x32xf32>
    %50 = arith.addf %46, %49 : vector<128x32xf32>
    %cst_43 = arith.constant dense<0.000000e+00> : vector<384x32xf32>
    %51 = tpu.matmul %19, %50, %cst_43 {dimension_numbers = #tpu.dot_dimension_numbers<[1], [0], [0], [1], [0, 0, 1, 1], [], []>} : vector<384x128xf32>, vector<128x32xf32>, vector<384x32xf32> -> vector<384x32xf32>
    %52 = vector.extract_strided_slice %51 {offsets = [0, 0], sizes = [128, 32], strides = [1, 1]} : vector<384x32xf32> to vector<128x32xf32>
    %c0_44 = arith.constant 0 : index
    %c0_45 = arith.constant 0 : index
    %53 = vector.load %arg15[%c0_44, %c0_45] : memref<128x128xf32, #tpu.memory_space<vmem>>, vector<128x32xf32>
    tpu.vector_store %arg15[%c0_44, %c0_45], %52 {strides = array<i32>} : memref<128x128xf32, #tpu.memory_space<vmem>>, vector<128x32xf32>,
    %54 = vector.extract_strided_slice %51 {offsets = [128, 0], sizes = [128, 32], strides = [1, 1]} : vector<384x32xf32> to vector<128x32xf32>
    %c0_46 = arith.constant 0 : index
    %c32_47 = arith.constant 32 : index
    %55 = vector.load %arg15[%c0_46, %c32_47] : memref<128x128xf32, #tpu.memory_space<vmem>>, vector<128x32xf32>
    tpu.vector_store %arg15[%c0_46, %c32_47], %54 {strides = array<i32>} : memref<128x128xf32, #tpu.memory_space<vmem>>, vector<128x32xf32>,
    %56 = vector.extract_strided_slice %51 {offsets = [256, 0], sizes = [128, 32], strides = [1, 1]} : vector<384x32xf32> to vector<128x32xf32>
    %c0_48 = arith.constant 0 : index
    %c64_49 = arith.constant 64 : index
    %57 = vector.load %arg15[%c0_48, %c64_49] : memref<128x128xf32, #tpu.memory_space<vmem>>, vector<128x32xf32>
    tpu.vector_store %arg15[%c0_48, %c64_49], %56 {strides = array<i32>} : memref<128x128xf32, #tpu.memory_space<vmem>>, vector<128x32xf32>,
    %c0_50 = arith.constant 0 : index
    %c0_51 = arith.constant 0 : index
    %58 = vector.load %arg15[%c0_50, %c0_51] : memref<128x128xf32, #tpu.memory_space<vmem>>, vector<128x128xf32>
    %c1 = arith.constant 1 : index
    %c0_52 = arith.constant 0 : index
    %c0_53 = arith.constant 0 : index
    %59 = vector.load %arg9[%c1, %c0_52, %c0_53] : memref<2x128x128xf32, #tpu.memory_space<vmem>>, vector<1x128x128xf32>
    %60 = vector.shape_cast %59 : vector<1x128x128xf32> to vector<128x128xf32>
    %cst_54 = arith.constant dense<0.000000e+00> : vector<128x128xf32>
    %61 = tpu.matmul %58, %60, %cst_54 {dimension_numbers = #tpu.dot_dimension_numbers<[1], [0], [0], [1], [0, 0, 1, 1], [], []>} : vector<128x128xf32>, vector<128x128xf32>, vector<128x128xf32> -> vector<128x128xf32>
    %c1_55 = arith.constant 1 : index
    %c0_56 = arith.constant 0 : index
    %c0_57 = arith.constant 0 : index
    %62 = vector.load %arg10[%c1_55, %c0_56, %c0_57] : memref<2x1x128xf32, #tpu.memory_space<vmem>>, vector<1x1x128xf32>
    %63 = vector.shape_cast %62 : vector<1x1x128xf32> to vector<1x128xf32>
    %64 = vector.broadcast %63 : vector<1x128xf32> to vector<128x128xf32>
    %65 = arith.addf %61, %64 : vector<128x128xf32>
    %cst_58 = arith.constant 0.000000e+00 : f32
    %66 = vector.broadcast %cst_58 : f32 to vector<128x128xf32>
    %67 = arith.maximumf %65, %66 : vector<128x128xf32>
    %c1_59 = arith.constant 1 : index
    %c0_60 = arith.constant 0 : index
    %c0_61 = arith.constant 0 : index
    %68 = vector.load %arg8[%c1_59, %c0_60, %c0_61] : memref<2x1x32xf32, #tpu.memory_space<vmem>>, vector<1x1x32xf32>
    %69 = vector.shape_cast %68 : vector<1x1x32xf32> to vector<1x32xf32>
    %cst_62 = arith.constant 1.000000e+00 : f32
    %70 = vector.broadcast %cst_62 : f32 to vector<1x32xf32>
    %71 = arith.addf %70, %69 : vector<1x32xf32>
    %72 = vector.broadcast %71 : vector<1x32xf32> to vector<128x32xf32>
    %73 = arith.mulf %72, %50 : vector<128x32xf32>
    %c1_63 = arith.constant 1 : index
    %c0_64 = arith.constant 0 : index
    %c0_65 = arith.constant 0 : index
    %74 = vector.load %arg11[%c1_63, %c0_64, %c0_65] : memref<2x128x32xf32, #tpu.memory_space<vmem>>, vector<1x128x32xf32>
    %75 = vector.shape_cast %74 : vector<1x128x32xf32> to vector<128x32xf32>
    %cst_66 = arith.constant dense<0.000000e+00> : vector<128x32xf32>
    %76 = tpu.matmul %67, %75, %cst_66 {dimension_numbers = #tpu.dot_dimension_numbers<[1], [0], [0], [1], [0, 0, 1, 1], [], []>} : vector<128x128xf32>, vector<128x32xf32>, vector<128x32xf32> -> vector<128x32xf32>
    %77 = arith.addf %73, %76 : vector<128x32xf32>
    %c1_67 = arith.constant 1 : index
    %c0_68 = arith.constant 0 : index
    %c0_69 = arith.constant 0 : index
    %78 = vector.load %arg12[%c1_67, %c0_68, %c0_69] : memref<2x1x32xf32, #tpu.memory_space<vmem>>, vector<1x1x32xf32>
    %79 = vector.shape_cast %78 : vector<1x1x32xf32> to vector<1x32xf32>
    %80 = vector.broadcast %79 : vector<1x32xf32> to vector<128x32xf32>
    %81 = arith.addf %77, %80 : vector<128x32xf32>
    %c0_70 = arith.constant 0 : index
    %c0_71 = arith.constant 0 : index
    %82 = vector.load %arg13[%c0_70, %c0_71] : memref<128x32xf32, #tpu.memory_space<vmem>>, vector<128x32xf32>
    tpu.vector_store %arg13[%c0_70, %c0_71], %81 {strides = array<i32>} : memref<128x32xf32, #tpu.memory_space<vmem>>, vector<128x32xf32>,
    %c0_72 = arith.constant 0 : index
    %c0_73 = arith.constant 0 : index
    %83 = vector.load %arg3[%c0_72, %c0_73] : memref<8x128xf32, #tpu.memory_space<vmem>>, vector<8x128xf32>
    %cst_74 = arith.constant dense<0.000000e+00> : vector<8x32xf32>
    %84 = tpu.matmul %83, %81, %cst_74 {dimension_numbers = #tpu.dot_dimension_numbers<[1], [0], [0], [1], [0, 0, 1, 1], [], []>} : vector<8x128xf32>, vector<128x32xf32>, vector<8x32xf32> -> vector<8x32xf32>
    %c0_75 = arith.constant 0 : index
    %c0_76 = arith.constant 0 : index
    %85 = vector.load %arg14[%c0_75, %c0_76] : memref<8x32xf32, #tpu.memory_space<vmem>>, vector<8x32xf32>
    tpu.vector_store %arg14[%c0_75, %c0_76], %84 {strides = array<i32>} : memref<8x32xf32, #tpu.memory_space<vmem>>, vector<8x32xf32>,
    return
  }
  func.func @transform_0(%arg0: i32) -> (i32, i32) {
    %c0_i32 = arith.constant 0 : i32
    %c0_i32_0 = arith.constant 0 : i32
    return %arg0, %c0_i32 : i32, i32
  }
  func.func @transform_1(%arg0: i32) -> (i32, i32, i32) {
    %c0_i32 = arith.constant 0 : i32
    %c0_i32_0 = arith.constant 0 : i32
    %c0_i32_1 = arith.constant 0 : i32
    return %arg0, %c0_i32, %c0_i32_0 : i32, i32, i32
  }
  func.func @transform_2(%arg0: i32) -> (i32, i32) {
    %c0_i32 = arith.constant 0 : i32
    %c0_i32_0 = arith.constant 0 : i32
    %c0_i32_1 = arith.constant 0 : i32
    return %c0_i32, %c0_i32_0 : i32, i32
  }
  func.func @transform_3(%arg0: i32) -> (i32, i32) {
    %c0_i32 = arith.constant 0 : i32
    %c0_i32_0 = arith.constant 0 : i32
    %c0_i32_1 = arith.constant 0 : i32
    return %c0_i32, %c0_i32_0 : i32, i32
  }
  func.func @transform_4(%arg0: i32) -> (i32, i32) {
    %c0_i32 = arith.constant 0 : i32
    %c0_i32_0 = arith.constant 0 : i32
    %c0_i32_1 = arith.constant 0 : i32
    return %c0_i32, %c0_i32_0 : i32, i32
  }
  func.func @transform_5(%arg0: i32) -> (i32, i32) {
    %c0_i32 = arith.constant 0 : i32
    %c0_i32_0 = arith.constant 0 : i32
    %c0_i32_1 = arith.constant 0 : i32
    return %c0_i32, %c0_i32_0 : i32, i32
  }
  func.func @transform_6(%arg0: i32) -> (i32, i32) {
    %c0_i32 = arith.constant 0 : i32
    %c0_i32_0 = arith.constant 0 : i32
    %c0_i32_1 = arith.constant 0 : i32
    return %c0_i32, %c0_i32_0 : i32, i32
  }
  func.func @transform_7(%arg0: i32) -> (i32, i32, i32) {
    %c0_i32 = arith.constant 0 : i32
    %c0_i32_0 = arith.constant 0 : i32
    %c0_i32_1 = arith.constant 0 : i32
    %c0_i32_2 = arith.constant 0 : i32
    return %c0_i32, %c0_i32_0, %c0_i32_1 : i32, i32, i32
  }
  func.func @transform_8(%arg0: i32) -> (i32, i32, i32) {
    %c0_i32 = arith.constant 0 : i32
    %c0_i32_0 = arith.constant 0 : i32
    %c0_i32_1 = arith.constant 0 : i32
    %c0_i32_2 = arith.constant 0 : i32
    return %c0_i32, %c0_i32_0, %c0_i32_1 : i32, i32, i32
  }
  func.func @transform_9(%arg0: i32) -> (i32, i32, i32) {
    %c0_i32 = arith.constant 0 : i32
    %c0_i32_0 = arith.constant 0 : i32
    %c0_i32_1 = arith.constant 0 : i32
    %c0_i32_2 = arith.constant 0 : i32
    return %c0_i32, %c0_i32_0, %c0_i32_1 : i32, i32, i32
  }
  func.func @transform_10(%arg0: i32) -> (i32, i32, i32) {
    %c0_i32 = arith.constant 0 : i32
    %c0_i32_0 = arith.constant 0 : i32
    %c0_i32_1 = arith.constant 0 : i32
    %c0_i32_2 = arith.constant 0 : i32
    return %c0_i32, %c0_i32_0, %c0_i32_1 : i32, i32, i32
  }
  func.func @transform_11(%arg0: i32) -> (i32, i32, i32) {
    %c0_i32 = arith.constant 0 : i32
    %c0_i32_0 = arith.constant 0 : i32
    %c0_i32_1 = arith.constant 0 : i32
    %c0_i32_2 = arith.constant 0 : i32
    return %c0_i32, %c0_i32_0, %c0_i32_1 : i32, i32, i32
  }
  func.func @transform_12(%arg0: i32) -> (i32, i32) {
    %c0_i32 = arith.constant 0 : i32
    %c0_i32_0 = arith.constant 0 : i32
    return %arg0, %c0_i32 : i32, i32
  }
  func.func @transform_13(%arg0: i32) -> (i32, i32) {
    %c0_i32 = arith.constant 0 : i32
    %c0_i32_0 = arith.constant 0 : i32
    return %arg0, %c0_i32 : i32, i32
  }
}

</mosaic_0001>

<bundles_post_ra>
// kernel: tpu_custom_call.1
= control target key start
LH: loop header
LB: loop body
LE: loop exit
PB: predicated region body
PF: predicated region fallthrough
CT: control target
= control target key end

     0   :  { %19 = vsyncpa [#allocation4], 0  ;;  %s5738_s0 = inlined_call_operand.vmem [shape: f32[512,8], index: 0, kind: input, shape index: {}]   ;;  %s5739_s1 = inlined_call_operand.vmem [shape: bf16[4,384,128], index: 1, kind: input, shape index: {}]   ;;  %s5740_s2 = inlined_call_operand.vmem [shape: f32[8,128], index: 2, kind: input, shape index: {}]   ;;  %s5741_s3 = inlined_call_operand.vmem [shape: f32[8,32], index: 3, kind: input, shape index: {}]   ;;  %s5742_s4 = inlined_call_operand.vmem [shape: f32[1,32], index: 4, kind: input, shape index: {}]   ;;  %s5743_s5 = inlined_call_operand.vmem [shape: f32[32,32], index: 5, kind: input, shape index: {}]   ;;  %s5744_s6 = inlined_call_operand.vmem [shape: f32[1,32], index: 6, kind: input, shape index: {}]   ;;  %s5745_s7 = inlined_call_operand.vmem [shape: f32[2,1,32], index: 7, kind: input, shape index: {}]   ;;  %s5746_s8 = inlined_call_operand.hbm [shape: f32[2,128,128], index: 8, kind: input, shape index: {}]   ;;  %s5747_s9 = inlined_call_operand.vmem [shape: f32[2,1,128], index: 9, kind: input, shape index: {}]   ;;  %s5748_s10 = inlined_call_operand.vmem [shape: f32[2,128,32], index: 10, kind: input, shape index: {}]   ;;  %s5749_s11 = inlined_call_operand.vmem [shape: f32[2,1,32], index: 11, kind: input, shape index: {}]   ;;  %s5750_s12 = inlined_call_operand.vmem [shape: f32[512,32], index: 12, kind: output, shape index: {0}]   ;;  %s5751_s13 = inlined_call_operand.hbm [shape: f32[32,32], index: 13, kind: output, shape index: {1}]  }
   0x1   :  { %20 = vsyncpa [#allocation5], 0 }
   0x2   :  { %22 = vsyncpa [#allocation5 + $0x1], 0  ;;  %s4578_s25 = smov 0   ;;  %s4580_s26 = smov 0  }
   0x3   :  { %s4582_s27 = smov 0   ;;  %s4584_s28 = smov 0  }
   0x4 LB: > { %5819 = sst [smem:[#allocation9_spill]] %s4493_s27  ;;  %s4599_s29 = sadd.s32 4294967295, %s4497_s28   ;;  %s4497_s28 = sphi %s4584_s28, %s5892_s28   ;;  %s4493_s27 = sphi %s4582_s27, %s5894_s27   ;;  %s4489_s26 = sphi %s4580_s26, %s5896_s26   ;;  %s4485_s25 = sphi %s4578_s25, %s5895_s25  }
   0x5   : > { %s3094_s30 = sadd.s32 4294967294, %s4497_s28   ;;  %s4603_s14 = sadd.s32 1, %s4497_s28  }
   0x6   : > { %5820 = sst [smem:[#allocation10_spill]] %s4603_s14  ;;  %s323_s15 = sadd.s32 1, %s4493_s27 }
   0x7   : > { %s320_s16 = ssub.s32 %s4497_s28, %s4603_s14  ;;  %p333_p0 = scmp.ne.s32.totalorder %s4493_s27, %s4489_s26 }
   0x8   : > { %p321_p1 = scmp.eq.s32.totalorder %s320_s16, 0  ;;  %p334_p2 = scmp.eq.s32.totalorder %s4599_s29, 3 }
   0x9   : > { %p339_p3 = scmp.ne.s32.totalorder %s4489_s26, %s4485_s25  ;;  %p340_p4 = scmp.eq.s32.totalorder %s3094_s30, 3 }
   0xa   : > { %s4614_s17 = scalar_select %p321_p1, %s4493_s27, %s323_s15  }
   0xb   : > { %p4616_p5 = por %p334_p2, %p333_p0  ;;  %p4620_p6 = por %p340_p4, %p339_p3 }
   0xc   : > { %5821 = sst [smem:[#allocation11_spill]] %s4614_s17  ;;  %p3095_p7 = scmp.ge.s32.totalorder %s4497_s28, 1 }
   0xd   : > { %s5822_s18 = scalar_select %p4616_p5, 1, 0 }
   0xe   : > { %s5823_s19 = scalar_select %p4620_p6, 1, 0 }
   0xf   : > { %p347_p8 = scmp.lt.s32.totalorder %s4497_s28, 5  ;;  %p5755_p9 = scmp.eq.s32.totalorder %s4599_s29, 0 }
  0x10   : > { %s4499_s21 = smov [#allocation3]   ;;  %s4403_s15 = scalar_lea.hbm %s5746_s8, 4096 }
  0x11   : > { %p4627_p10 = pnand %p3095_p7, %p347_p8  ;;  %s377_s22 = sshll.u32 %s4499_s21, 4  ;;  %s378_s22 = int_to_ptr.vmem [resolvable:$true] %s377_s22 }
  0x12   : > { %p4404_p13 = scmp.ne.s32.totalorder %s5746_s8, %s4403_s15  ;;  %p4410_p3 = scmp.lt.u32.totalorder %s4403_s15, %s5746_s8 }
  0x13   : > { %s5824_s20 = scalar_select %p4627_p10, 1, 0 }
  0x14   : > { %p4352_p11 = pneg %p4627_p10 }
  0x16   : > { %p4635_p12 = pnand %p5755_p9, %p4352_p11 }
  0x18   : > { %p4405_p0 = pneg %p4635_p12 }
  0x1a   : > { %p4406_p1 = pnand %p4405_p0, %p4404_p13 }
  0x1c   : > { %p4407_p2 = pneg %p4406_p1 }
  0x1e   : > { %p4412_p4 = pnand %p4410_p3, %p4407_p2 }
  0x20   : > { %4415 = shalt.err (!%p4412_p4)
}
  0x21   : > { %s4416_s14 = scalar_lea.vmem %s378_s22, 4096  ;;  %p4424_p9 = scmp.lt.s32.totalorder %s378_s22, %s378_s22 }
  0x22   : > { %p4417_p7 = scmp.ne.s32.totalorder %s378_s22, %s4416_s14  ;;  %p4425_p6 = scmp.lt.s32.totalorder %s4416_s14, %s4416_s14 }
  0x24   : > { %p4419_p8 = pnand %p4417_p7, %p4405_p0  ;;  %p4426_p5 = por %p4425_p6, %p4424_p9 }
  0x26   : > { %p4420_p11 = pneg %p4419_p8 }
  0x28   : > { %p4427_p10 = pnand %p4426_p5, %p4420_p11 }
  0x2a   : > { %4430 = shalt.err (!%p4427_p10)
}
  0x2b   : > { %s4500_s17 = smov 128   ;;  %s4501_s24 = smov 8  }
  0x2c   : > { %4355 = dma.hbm_to_vmem [thread:$0]  (!%p4635_p12), %s5746_s8, 4096, %s378_s22, [#allocation4], %s4500_s17, %s4500_s17, %s4501_s24  }
  0x2d   : > { %p5826_p13 = scmp.ne.s32.totalorder %s5824_s20, 0 }
  0x2e   : > { %p5827_p1 = scmp.eq.s32.totalorder (!%p5826_p13), %s4599_s29, 0 }
  0x2f   : > { %419 = sbr.rel (%p5826_p13) target bundleno = 2503 (0x9c7), region = 68 }
  0x36   : > { %4476 = dma.done.wait (%p5827_p1), [#allocation4], 4096   ;;  %p5828_p0 = pmov %p5827_p1 }
  0x37   : > { %s3101_s27 = sshll.u32 %s4599_s29, 4  ;;  %vm514_vm0 = vcmask 64512   ;;  %v506_v0 = vld [vmem:[%s5741_s3] sm:$0xff]  ;;  %v725_v7 = vld [vmem:[%s5743_s5 + $0x8] sm:$0xff]  ;;  %v726_v20 = vld [vmem:[%s5743_s5 + $0x10] sm:$0xff]  ;;  %vm735_vm1 = vcmask 261120  }
  0x38   : > { %4478 = vsyncadd (%p5828_p0), [#allocation4], 4294963200  ;;  %p474_p5 = scmp.lt.s32.totalorder %s3101_s27, 63  ;;  %3596 = vmatprep.subr.mxu0 %v506_v0  ;;  %v724_v6 = vld [vmem:[%s5743_s5] sm:$0xff]  ;;  %v727_v21 = vld [vmem:[%s5743_s5 + $0x18] sm:$0xff]  ;;  %p479_p6 = scmp.lt.s32.totalorder %s4599_s29, 3 }
  0x39   : > { %3597 = vmatpush3.msra.mxu0 %v506_v0  ;;  %v4121_v8 = vpack.c.bf16 %v725_v7, %v724_v6  ;;  %v4125_v22 = vpack.c.bf16 %v727_v21, %v726_v20  ;;  %v3106_v23 = vld [vmem:[%s5742_s4] ss:$0 sm:$0xff]  ;;  %vm945_vm2 = vcmask 1048320   ;;  %v5758_v20 = vmov 0.0   ;;  %s4503_s17 = smov 32   ;;  %s4504_s24 = smov 64  }
  0x3a   : > { %s5898_s27 = smov (!%p474_p5, %s3101_s27), 63  ;;  %947 = vst.msk [vmem:[#allocation2 + $0x8] sm:$0xff] %vm945_vm2, %v5758_v20  ;;  %946 = vst.msk [vmem:[#allocation2] sm:$0xff] %vm945_vm2, %v5758_v20  ;;  %vm1443_vm3 = vcmask 523520   ;;  %vm1524_vm4 = vcmask 785920   ;;  %vm4506_vm5 = vmmov 0  }
  0x3b   : > { %s3102_s14 = sshll.u32 %s5898_s27, 3  ;;  %4122 = vmatprep.subr.bf16.mxu1 %v4121_v8  ;;  %948 = vst.msk [vmem:[#allocation2 + $0x10] sm:$0xff] %vm945_vm2, %v5758_v20  ;;  %949 = vst.msk [vmem:[#allocation2 + $0x18] sm:$0xff] %vm945_vm2, %v5758_v20  ;;  %s470_s21 = sand.u32 1, %s4489_s26  }
  0x3c   : > { %s4670_s20 = scalar_lea.vmem %s5738_s0, %s3102_s14  ;;  %4124 = vmatpush3.bf16.msra.mxu1 %v4121_v8  ;;  %950 = vst.msk [vmem:[#allocation2 + $0x20] sm:$0xff] %vm945_vm2, %v5758_v20  ;;  %951 = vst.msk [vmem:[#allocation2 + $0x28] sm:$0xff] %vm945_vm2, %v5758_v20  ;;  %p5890_p10 = scmp.ne.s32.totalorder %s5822_s18, 0 }
  0x3d   : > { %v490_v1 = vld [vmem:[%s4670_s20] sm:$0xff]  ;;  %v491_v2 = vld [vmem:[%s4670_s20 + $0x8] sm:$0xff]  ;;  %v492_v3 = vld [vmem:[%s4670_s20 + $0x10] sm:$0xff]  ;;  %4126 = vmatprep.subr.bf16.mxu1 %v4125_v22  ;;  %952 = vst.msk [vmem:[#allocation2 + $0x30] sm:$0xff] %vm945_vm2, %v5758_v20 }
  0x3e   : > { %3598 = vmatprep.mubr.msk.f32.mxu0 %vm514_vm0, %v490_v1  ;;  %v493_v4 = vld [vmem:[%s4670_s20 + $0x18] sm:$0xff]  ;;  %v494_v5 = vld [vmem:[%s4670_s20 + $0x20] sm:$0xff]  ;;  %v495_v9 = vld [vmem:[%s4670_s20 + $0x28] sm:$0xff]  ;;  %953 = vst.msk [vmem:[#allocation2 + $0x38] sm:$0xff] %vm945_vm2, %v5758_v20 }
  0x3f   : > { %3599 = vmatmul.mubr.msk.f32.vlgmr.msra.gmra.mrb[0].mxu0 %vm514_vm0, %v491_v2  ;;  %v496_v10 = vld [vmem:[%s4670_s20 + $0x30] sm:$0xff]  ;;  %v497_v11 = vld [vmem:[%s4670_s20 + $0x38] sm:$0xff]  ;;  %v498_v12 = vld [vmem:[%s4670_s20 + $0x40] sm:$0xff]  ;;  %954 = vst.msk [vmem:[#allocation2 + $0x40] sm:$0xff] %vm945_vm2, %v5758_v20 }
  0x40   : > { %3601 = vmatprep.mubr.msk.f32.mxu0 %vm514_vm0, %v492_v3  ;;  %v499_v13 = vld [vmem:[%s4670_s20 + $0x48] sm:$0xff]  ;;  %v500_v14 = vld [vmem:[%s4670_s20 + $0x50] sm:$0xff]  ;;  %v501_v15 = vld [vmem:[%s4670_s20 + $0x58] sm:$0xff]  ;;  %4128 = vmatpush3.bf16.msra.mxu1 %v4125_v22  ;;  %955 = vst.msk [vmem:[#allocation2 + $0x48] sm:$0xff] %vm945_vm2, %v5758_v20 }
  0x41   : > { %v502_v16 = vld [vmem:[%s4670_s20 + $0x60] sm:$0xff]  ;;  %v503_v17 = vld [vmem:[%s4670_s20 + $0x68] sm:$0xff]  ;;  %v504_v18 = vld [vmem:[%s4670_s20 + $0x70] sm:$0xff]  ;;  %956 = vst.msk [vmem:[#allocation2 + $0x50] sm:$0xff] %vm945_vm2, %v5758_v20 }
  0x42   : > { %v505_v19 = vld [vmem:[%s4670_s20 + $0x78] sm:$0xff]  ;;  %s480_s20 = scalar_select %p479_p6, %s4599_s29, 3  ;;  %957 = vst.msk [vmem:[#allocation2 + $0x58] sm:$0xff] %vm945_vm2, %v5758_v20  ;;  %958 = vst.msk [vmem:[#allocation2 + $0x60] sm:$0xff] %vm945_vm2, %v5758_v20 }
  0x43   : > { %3602 = vmatmul.mubr.msk.f32.gmra.mrb[2].mxu0 %vm514_vm0, %v493_v4  ;;  %959 = vst.msk [vmem:[#allocation2 + $0x68] sm:$0xff] %vm945_vm2, %v5758_v20  ;;  %960 = vst.msk [vmem:[#allocation2 + $0x70] sm:$0xff] %vm945_vm2, %v5758_v20 }
  0x44   : > { %3604 = vmatprep.mubr.msk.f32.mxu0 %vm514_vm0, %v494_v5  ;;  %s4345_s30 = smul.u32 192, %s480_s20  ;;  %961 = vst.msk [vmem:[#allocation2 + $0x78] sm:$0xff] %vm945_vm2, %v5758_v20  ;;  %s3100_s20 = sshll.u32 %s470_s21, 3 }
  0x45   : > { %s472_s16 = scalar_lea.vmem [#allocation6], %s3100_s20 }
  0x46   : > { %s4743_s23 = scalar_lea.vmem %s5739_s1, %s4345_s30  ;;  %s3164_s30 = sshll.u32 %s4599_s29, 7 }
  0x47   : > { %3605 = vmatmul.mubr.msk.f32.gmra.mrb[4].mxu0 %vm514_vm0, %v495_v9  ;;  %v4746_v8 = vld [vmem:[%s4743_s23] sm:$0xff]   ;;  %s5695_s15 = scalar_lea.hbm %s5751_s13, %s3164_s30  ;;  %s4507_s29 = smov [#allocation6]  }
  0x48   : > { %3607 = vmatprep.mubr.msk.f32.mxu0 %vm514_vm0, %v496_v10  ;;  %v3169_v9 = vunpack.c.l.bf16 %v4746_v8  ;;  %v4754_v10 = vld [vmem:[%s5744_s6] ss:$0 sm:$0xff] }
  0x4b   : > { %3608 = vmatmul.mubr.msk.f32.gmra.mrb[6].mxu0 %vm514_vm0, %v497_v11 }
  0x4c   : > { %3610 = vmatprep.mubr.msk.f32.mxu0 %vm514_vm0, %v498_v12 }
  0x4f   : > { %3611 = vmatmul.mubr.msk.f32.gmra.mrb[8].mxu0 %vm514_vm0, %v499_v13 }
  0x50   : > { %3613 = vmatprep.mubr.msk.f32.mxu0 %vm514_vm0, %v500_v14 }
  0x53   : > { %3614 = vmatmul.mubr.msk.f32.gmra.mrb[10].mxu0 %vm514_vm0, %v501_v15 }
  0x54   : > { %3616 = vmatprep.mubr.msk.f32.mxu0 %vm514_vm0, %v502_v16 }
  0x57   : > { %3617 = vmatmul.mubr.msk.f32.gmra.mrb[12].mxu0 %vm514_vm0, %v503_v17 }
  0x58   : > { %3619 = vmatprep.mubr.msk.f32.mxu0 %vm514_vm0, %v504_v18 }
  0x5b   : > { %3620 = vmatmul.mubr.msk.f32.gmra.mrb[14].mxu0 %vm514_vm0, %v505_v19 }
  0x5c   : > { %3686 = vmatprep.mubr.f32.mxu0 %v3169_v9 }
 0x112   : > { %v3600_v24 = vpop.f32.mrb[0].mxu0 }
 0x113   : > { %v635_v25 = vadd.f32 %v3600_v24, %v3106_v23  ;;  %v629_v26 = vpop.f32.mrb[1].mxu0 }
 0x114   : > { %v630_v27 = vadd.f32 %v3106_v23, %v629_v26 }
 0x115   : > { %v709_v30 = vmax.f32 %v635_v25, 0.0 }
 0x116   : > { %v708_v28 = vmax.f32 %v630_v27, 0.0  ;;  %v3603_v29 = vpop.f32.mrb[2].mxu0 }
 0x117   : > { %v645_v31 = vadd.f32 %v3603_v29, %v3106_v23  ;;  %v639_v32 = vpop.f32.mrb[3].mxu0 }
 0x118   : > { %v640_v33 = vadd.f32 %v3106_v23, %v639_v32  ;;  %3630 = vmatprep.mubr.msk.f32.mxu1 %vm735_vm1, %v708_v28 }
 0x119   : > { %3631 = vmatmul.mubr.msk.f32.vlgmr.msra.gmra.mrb[0].mxu1 %vm735_vm1, %v709_v30  ;;  %v711_v36 = vmax.f32 %v645_v31, 0.0 }
 0x11a   : > { %v710_v34 = vmax.f32 %v640_v33, 0.0  ;;  %v3606_v35 = vpop.f32.mrb[4].mxu0 }
 0x11b   : > { %v655_v37 = vadd.f32 %v3606_v35, %v3106_v23  ;;  %v649_v38 = vpop.f32.mrb[5].mxu0 }
 0x11c   : > { %v650_v39 = vadd.f32 %v3106_v23, %v649_v38  ;;  %3633 = vmatprep.mubr.msk.f32.mxu1 %vm735_vm1, %v710_v34 }
 0x11d   : > { %3634 = vmatmul.mubr.msk.f32.gmra.mrb[2].mxu1 %vm735_vm1, %v711_v36  ;;  %v713_v42 = vmax.f32 %v655_v37, 0.0 }
 0x11e   : > { %v712_v40 = vmax.f32 %v650_v39, 0.0  ;;  %v3609_v41 = vpop.f32.mrb[6].mxu0 }
 0x11f   : > { %v665_v43 = vadd.f32 %v3609_v41, %v3106_v23  ;;  %v659_v44 = vpop.f32.mrb[7].mxu0 }
 0x120   : > { %v660_v45 = vadd.f32 %v3106_v23, %v659_v44  ;;  %3636 = vmatprep.mubr.msk.f32.mxu1 %vm735_vm1, %v712_v40 }
 0x121   : > { %3637 = vmatmul.mubr.msk.f32.gmra.mrb[4].mxu1 %vm735_vm1, %v713_v42  ;;  %v715_v48 = vmax.f32 %v665_v43, 0.0 }
 0x122   : > { %v714_v46 = vmax.f32 %v660_v45, 0.0  ;;  %v3612_v47 = vpop.f32.mrb[8].mxu0 }
 0x123   : > { %v675_v49 = vadd.f32 %v3612_v47, %v3106_v23  ;;  %v669_v50 = vpop.f32.mrb[9].mxu0 }
 0x124   : > { %v670_v51 = vadd.f32 %v3106_v23, %v669_v50  ;;  %3639 = vmatprep.mubr.msk.f32.mxu1 %vm735_vm1, %v714_v46 }
 0x125   : > { %3640 = vmatmul.mubr.msk.f32.gmra.mrb[6].mxu1 %vm735_vm1, %v715_v48  ;;  %v717_v54 = vmax.f32 %v675_v49, 0.0 }
 0x126   : > { %v716_v52 = vmax.f32 %v670_v51, 0.0  ;;  %v3615_v53 = vpop.f32.mrb[10].mxu0 }
 0x127   : > { %v685_v55 = vadd.f32 %v3615_v53, %v3106_v23  ;;  %v679_v56 = vpop.f32.mrb[11].mxu0 }
 0x128   : > { %v680_v57 = vadd.f32 %v3106_v23, %v679_v56  ;;  %3642 = vmatprep.mubr.msk.f32.mxu1 %vm735_vm1, %v716_v52 }
 0x129   : > { %3643 = vmatmul.mubr.msk.f32.gmra.mrb[8].mxu1 %vm735_vm1, %v717_v54  ;;  %v719_v60 = vmax.f32 %v685_v55, 0.0 }
 0x12a   : > { %v718_v58 = vmax.f32 %v680_v57, 0.0  ;;  %v3618_v59 = vpop.f32.mrb[12].mxu0 }
 0x12b   : > { %v695_v61 = vadd.f32 %v3618_v59, %v3106_v23  ;;  %v689_v62 = vpop.f32.mrb[13].mxu0 }
 0x12c   : > { %v690_v63 = vadd.f32 %v3106_v23, %v689_v62  ;;  %3645 = vmatprep.mubr.msk.f32.mxu1 %vm735_vm1, %v718_v58 }
 0x12d   : > { %3646 = vmatmul.mubr.msk.f32.gmra.mrb[10].mxu1 %vm735_vm1, %v719_v60  ;;  %v721_v2 = vmax.f32 %v695_v61, 0.0 }
 0x12e   : > { %v720_v0 = vmax.f32 %v690_v63, 0.0  ;;  %v3621_v1 = vpop.f32.mrb[14].mxu0 }
 0x12f   : > { %v705_v3 = vadd.f32 %v3621_v1, %v3106_v23  ;;  %v699_v4 = vpop.f32.mrb[15].mxu0 }
 0x130   : > { %v700_v5 = vadd.f32 %v3106_v23, %v699_v4  ;;  %3648 = vmatprep.mubr.msk.f32.mxu1 %vm735_vm1, %v720_v0  ;;  %v4885_v4 = vld [vmem:[%s4743_s23 + $0x8] sm:$0xff]  }
 0x131   : > { %3649 = vmatmul.mubr.msk.f32.gmra.mrb[12].mxu1 %vm735_vm1, %v721_v2  ;;  %v723_v7 = vmax.f32 %v705_v3, 0.0 }
 0x132   : > { %v722_v6 = vmax.f32 %v700_v5, 0.0  ;;  %v5802_v5 = vunpack.c.h.bf16 %v4746_v8 }
 0x134   : > { %3651 = vmatprep.mubr.msk.f32.mxu1 %vm735_vm1, %v722_v6  ;;  %v5797_v6 = vunpack.c.l.bf16 %v4885_v4 }
 0x135   : > { %3652 = vmatmul.mubr.msk.f32.gmra.mrb[14].mxu1 %vm735_vm1, %v723_v7  ;;  %v4890_v7 = vld [vmem:[%s4743_s23 + $0x10] sm:$0xff]  }
 0x1ec   : > { %v3632_v11 = vpop.f32.mrb[0].mxu1 }
 0x1ed   : > { %v4757_v12 = vadd.f32 %v3632_v11, %v4754_v10  ;;  %v850_v13 = vpop.f32.mrb[1].mxu1  ;;  %v5791_v11 = vunpack.c.l.bf16 %v4890_v7 }
 0x1ee   : > { %v4760_v14 = vadd.f32 %v4754_v10, %v850_v13  ;;  %v4899_v13 = vld [vmem:[%s4743_s23 + $0x18] sm:$0xff]  }
 0x1ef   : > { %v930_v15 = vmax.f32 %v4757_v12, 0.0 }
 0x1f0   : > { %v929_v16 = vmax.f32 %v4760_v14, 0.0  ;;  %v3635_v17 = vpop.f32.mrb[2].mxu1 }
 0x1f1   : > { %v4765_v18 = vadd.f32 %v3635_v17, %v4754_v10  ;;  %v860_v19 = vpop.f32.mrb[3].mxu1  ;;  %v5789_v17 = vunpack.c.h.bf16 %v4890_v7 }
 0x1f2   : > { %v4129_v21 = vpack.c.bf16 %v930_v15, %v929_v16  ;;  %v4804_v22 = vadd.f32 %v4754_v10, %v860_v19  ;;  %v5786_v19 = vunpack.c.l.bf16 %v4899_v13 }
 0x1f3   : > { %v932_v23 = vmax.f32 %v4765_v18, 0.0 }
 0x1f4   : > { %v5818_v24 = vmax.f32 %v4804_v22, 0.0  ;;  %v3638_v25 = vpop.f32.mrb[4].mxu1  ;;  %4130 = vmatprep.subr.bf16.mxu0 %v4129_v21  ;;  %v5829_v14 = vmax.f32 %v4804_v22, 0.0 }
 0x1f5   : > { %v4809_v26 = vadd.f32 %v3638_v25, %v4754_v10  ;;  %v870_v27 = vpop.f32.mrb[5].mxu1  ;;  %4132 = vmatpush3.bf16.msra.mxu0 %v4129_v21  ;;  %v4908_v21 = vld [vmem:[%s4743_s23 + $0x20] sm:$0xff]   ;;  %v5783_v25 = vunpack.c.h.bf16 %v4899_v13 }
 0x1f6   : > { %v4133_v28 = vpack.c.bf16 %v932_v23, %v5818_v24  ;;  %v4816_v29 = vadd.f32 %v4754_v10, %v870_v27  ;;  %v5780_v27 = vunpack.c.l.bf16 %v4908_v21 }
 0x1f7   : > { %v5817_v30 = vmax.f32 %v4809_v26, 0.0  ;;  %v5830_v18 = vmax.f32 %v4809_v26, 0.0 }
 0x1f8   : > { %v5816_v31 = vmax.f32 %v4816_v29, 0.0  ;;  %v3641_v32 = vpop.f32.mrb[6].mxu1  ;;  %4134 = vmatprep.subr.bf16.mxu0 %v4133_v28  ;;  %v5831_v22 = vmax.f32 %v4816_v29, 0.0 }
 0x1f9   : > { %v4821_v33 = vadd.f32 %v3641_v32, %v4754_v10  ;;  %v880_v34 = vpop.f32.mrb[7].mxu1  ;;  %4136 = vmatpush3.bf16.msra.mxu0 %v4133_v28  ;;  %v4917_v28 = vld [vmem:[%s4743_s23 + $0x28] sm:$0xff]   ;;  %v5777_v32 = vunpack.c.h.bf16 %v4908_v21 }
 0x1fa   : > { %v4137_v35 = vpack.c.bf16 %v5817_v30, %v5816_v31  ;;  %v4828_v36 = vadd.f32 %v4754_v10, %v880_v34  ;;  %v5774_v34 = vunpack.c.l.bf16 %v4917_v28 }
 0x1fb   : > { %v5815_v37 = vmax.f32 %v4821_v33, 0.0  ;;  %v5832_v26 = vmax.f32 %v4821_v33, 0.0 }
 0x1fc   : > { %v5814_v38 = vmax.f32 %v4828_v36, 0.0  ;;  %v3644_v39 = vpop.f32.mrb[8].mxu1  ;;  %4138 = vmatprep.subr.bf16.mxu0 %v4137_v35  ;;  %v5833_v29 = vmax.f32 %v4828_v36, 0.0 }
 0x1fd   : > { %v4833_v40 = vadd.f32 %v3644_v39, %v4754_v10  ;;  %v890_v41 = vpop.f32.mrb[9].mxu1  ;;  %4140 = vmatpush3.bf16.msra.mxu0 %v4137_v35  ;;  %v4926_v35 = vld [vmem:[%s4743_s23 + $0x30] sm:$0xff]   ;;  %v5771_v39 = vunpack.c.h.bf16 %v4917_v28 }
 0x1fe   : > { %v4141_v42 = vpack.c.bf16 %v5815_v37, %v5814_v38  ;;  %v4840_v43 = vadd.f32 %v4754_v10, %v890_v41  ;;  %v5768_v41 = vunpack.c.l.bf16 %v4926_v35 }
 0x1ff   : > { %v5813_v44 = vmax.f32 %v4833_v40, 0.0 }
 0x200   : > { %v5812_v45 = vmax.f32 %v4840_v43, 0.0  ;;  %v3647_v46 = vpop.f32.mrb[10].mxu1  ;;  %4142 = vmatprep.subr.bf16.mxu0 %v4141_v42 }
 0x201   : > { %v4845_v47 = vadd.f32 %v3647_v46, %v4754_v10  ;;  %v900_v48 = vpop.f32.mrb[11].mxu1  ;;  %4144 = vmatpush3.bf16.msra.mxu0 %v4141_v42  ;;  %v4935_v42 = vld [vmem:[%s4743_s23 + $0x38] sm:$0xff]   ;;  %v5765_v46 = vunpack.c.h.bf16 %v4926_v35 }
 0x202   : > { %v4145_v49 = vpack.c.bf16 %v5813_v44, %v5812_v45  ;;  %v4852_v50 = vadd.f32 %v4754_v10, %v900_v48  ;;  %v5762_v48 = vunpack.c.l.bf16 %v4935_v42 }
 0x203   : > { %v5811_v51 = vmax.f32 %v4845_v47, 0.0 }
 0x204   : > { %v5810_v52 = vmax.f32 %v4852_v50, 0.0  ;;  %v3650_v53 = vpop.f32.mrb[12].mxu1  ;;  %4146 = vmatprep.subr.bf16.mxu0 %v4145_v49 }
 0x205   : > { %v4857_v54 = vadd.f32 %v3650_v53, %v4754_v10  ;;  %v910_v55 = vpop.f32.mrb[13].mxu1  ;;  %4148 = vmatpush3.bf16.msra.mxu0 %v4145_v49  ;;  %v4944_v49 = vld [vmem:[%s4743_s23 + $0x40] sm:$0xff]   ;;  %v5759_v53 = vunpack.c.h.bf16 %v4935_v42 }
 0x206   : > { %v4149_v56 = vpack.c.bf16 %v5811_v51, %v5810_v52  ;;  %v4864_v57 = vadd.f32 %v4754_v10, %v910_v55  ;;  %v5760_v55 = vunpack.c.l.bf16 %v4944_v49  ;;  %v1562_v52 = vld [vmem:[#allocation3 + $0x28] sm:$0xff] }
 0x207   : > { %v5809_v58 = vmax.f32 %v4857_v54, 0.0 }
 0x208   : > { %v5808_v59 = vmax.f32 %v4864_v57, 0.0  ;;  %v3653_v60 = vpop.f32.mrb[14].mxu1  ;;  %4150 = vmatprep.subr.bf16.mxu0 %v4149_v56 }
 0x209   : > { %v4869_v61 = vadd.f32 %v3653_v60, %v4754_v10  ;;  %v920_v62 = vpop.f32.mrb[15].mxu1  ;;  %4152 = vmatpush3.bf16.msra.mxu0 %v4149_v56  ;;  %v4953_v56 = vld [vmem:[%s4743_s23 + $0x48] sm:$0xff]   ;;  %v5761_v60 = vunpack.c.h.bf16 %v4944_v49 }
 0x20a   : > { %v4153_v63 = vpack.c.bf16 %v5809_v58, %v5808_v59  ;;  %v4876_v0 = vadd.f32 %v4754_v10, %v920_v62  ;;  %v5794_v10 = vunpack.c.h.bf16 %v4885_v4  ;;  %v5763_v62 = vunpack.c.l.bf16 %v4953_v56 }
 0x20b   : > { %v5807_v1 = vmax.f32 %v4869_v61, 0.0 }
 0x20c   : > { %v5804_v2 = vmax.f32 %v4876_v0, 0.0  ;;  %4154 = vmatprep.subr.bf16.mxu0 %v4153_v63 }
 0x20d   : > { %4156 = vmatpush3.bf16.msra.mxu0 %v4153_v63  ;;  %v4962_v63 = vld [vmem:[%s4743_s23 + $0x50] sm:$0xff]  }
 0x20e   : > { %v4157_v3 = vpack.c.bf16 %v5807_v1, %v5804_v2  ;;  %v5766_v20 = vunpack.c.l.bf16 %v4962_v63 }
 0x210   : > { %4158 = vmatprep.subr.bf16.mxu0 %v4157_v3 }
 0x211   : > { %4160 = vmatpush3.bf16.msra.mxu0 %v4157_v3  ;;  %v5764_v3 = vunpack.c.h.bf16 %v4953_v56 }
 0x214   : > { %3687 = vmatmul.mubr.f32.vlgmr.msra.gmra.mrb[16].mxu0 %v5802_v5 }
 0x215   : > { %3689 = vmatprep.mubr.f32.mxu0 %v5797_v6 }
 0x218   : > { %3690 = vmatmul.mubr.f32.gmra.mrb[18].mxu0 %v5794_v10 }
 0x219   : > { %3692 = vmatprep.mubr.f32.mxu0 %v5791_v11 }
 0x21c   : > { %3693 = vmatmul.mubr.f32.gmra.mrb[20].mxu0 %v5789_v17  ;;  %v5061_v17 = vld [vmem:[%s4743_s23 + $0xa8] sm:$0xff]  }
 0x21d   : > { %3695 = vmatprep.mubr.f32.mxu0 %v5786_v19  ;;  %v5052_v19 = vld [vmem:[%s4743_s23 + $0xa0] sm:$0xff]   ;;  %v5799_v11 = vunpack.c.l.bf16 %v5061_v17 }
 0x220   : > { %3696 = vmatmul.mubr.f32.gmra.mrb[22].mxu0 %v5783_v25  ;;  %v5043_v25 = vld [vmem:[%s4743_s23 + $0x98] sm:$0xff]  }
 0x221   : > { %3698 = vmatprep.mubr.f32.mxu0 %v5780_v27  ;;  %v5034_v27 = vld [vmem:[%s4743_s23 + $0x90] sm:$0xff]  }
 0x224   : > { %3699 = vmatmul.mubr.f32.gmra.mrb[24].mxu0 %v5777_v32  ;;  %v5025_v32 = vld [vmem:[%s4743_s23 + $0x88] sm:$0xff]  }
 0x225   : > { %3701 = vmatprep.mubr.f32.mxu0 %v5774_v34  ;;  %v5016_v34 = vld [vmem:[%s4743_s23 + $0x80] sm:$0xff]  }
 0x228   : > { %3702 = vmatmul.mubr.f32.gmra.mrb[26].mxu0 %v5771_v39  ;;  %v5007_v39 = vld [vmem:[%s4743_s23 + $0x78] sm:$0xff]  }
 0x229   : > { %3704 = vmatprep.mubr.f32.mxu0 %v5768_v41  ;;  %v4998_v41 = vld [vmem:[%s4743_s23 + $0x70] sm:$0xff]  }
 0x22c   : > { %3705 = vmatmul.mubr.f32.gmra.mrb[28].mxu0 %v5765_v46  ;;  %v4989_v46 = vld [vmem:[%s4743_s23 + $0x68] sm:$0xff]  }
 0x22d   : > { %3707 = vmatprep.mubr.f32.mxu0 %v5762_v48  ;;  %v4980_v48 = vld [vmem:[%s4743_s23 + $0x60] sm:$0xff]  }
 0x230   : > { %3708 = vmatmul.mubr.f32.gmra.mrb[30].mxu0 %v5759_v53  ;;  %v4971_v53 = vld [vmem:[%s4743_s23 + $0x58] sm:$0xff]  }
 0x231   : > { %3710 = vmatprep.mubr.f32.mxu0 %v5760_v55  ;;  %v5767_v55 = vunpack.c.h.bf16 %v4962_v63 }
 0x234   : > { %3711 = vmatmul.mubr.f32.gmra.mrb[32].mxu0 %v5761_v60  ;;  %v5769_v60 = vunpack.c.l.bf16 %v4971_v53 }
 0x235   : > { %3713 = vmatprep.mubr.f32.mxu0 %v5763_v62  ;;  %v5770_v62 = vunpack.c.h.bf16 %v4971_v53 }
 0x238   : > { %3714 = vmatmul.mubr.f32.gmra.mrb[34].mxu0 %v5764_v3  ;;  %v5772_v3 = vunpack.c.l.bf16 %v4980_v48 }
 0x239   : > { %3716 = vmatprep.mubr.f32.mxu0 %v5766_v20  ;;  %v5773_v20 = vunpack.c.h.bf16 %v4980_v48 }
 0x23c   : > { %3717 = vmatmul.mubr.f32.gmra.mrb[36].mxu0 %v5767_v55  ;;  %v5775_v55 = vunpack.c.l.bf16 %v4989_v46 }
 0x23d   : > { %3719 = vmatprep.mubr.f32.mxu0 %v5769_v60  ;;  %v5776_v60 = vunpack.c.h.bf16 %v4989_v46 }
 0x240   : > { %3720 = vmatmul.mubr.f32.gmra.mrb[38].mxu0 %v5770_v62  ;;  %v5778_v62 = vunpack.c.l.bf16 %v4998_v41 }
 0x241   : > { %3722 = vmatprep.mubr.f32.mxu0 %v5772_v3  ;;  %v5779_v3 = vunpack.c.h.bf16 %v4998_v41 }
 0x244   : > { %3723 = vmatmul.mubr.f32.gmra.mrb[40].mxu0 %v5773_v20  ;;  %v5781_v20 = vunpack.c.l.bf16 %v5007_v39 }
 0x245   : > { %3725 = vmatprep.mubr.f32.mxu0 %v5775_v55  ;;  %v5782_v55 = vunpack.c.h.bf16 %v5007_v39 }
 0x248   : > { %3726 = vmatmul.mubr.f32.gmra.mrb[42].mxu0 %v5776_v60  ;;  %v5784_v60 = vunpack.c.l.bf16 %v5016_v34 }
 0x249   : > { %3728 = vmatprep.mubr.f32.mxu0 %v5778_v62  ;;  %v5785_v62 = vunpack.c.h.bf16 %v5016_v34 }
 0x24c   : > { %3729 = vmatmul.mubr.f32.gmra.mrb[44].mxu0 %v5779_v3  ;;  %v5787_v3 = vunpack.c.l.bf16 %v5025_v32 }
 0x24d   : > { %3731 = vmatprep.mubr.f32.mxu0 %v5781_v20  ;;  %v5788_v20 = vunpack.c.h.bf16 %v5025_v32 }
 0x250   : > { %3732 = vmatmul.mubr.f32.gmra.mrb[46].mxu0 %v5782_v55  ;;  %v5790_v55 = vunpack.c.l.bf16 %v5034_v27 }
 0x251   : > { %3734 = vmatprep.mubr.f32.mxu0 %v5784_v60  ;;  %v5792_v60 = vunpack.c.h.bf16 %v5034_v27 }
 0x254   : > { %3735 = vmatmul.mubr.f32.gmra.mrb[48].mxu0 %v5785_v62  ;;  %v5793_v62 = vunpack.c.l.bf16 %v5043_v25 }
 0x255   : > { %3737 = vmatprep.mubr.f32.mxu0 %v5787_v3  ;;  %v5795_v3 = vunpack.c.h.bf16 %v5043_v25 }
 0x258   : > { %3738 = vmatmul.mubr.f32.gmra.mrb[50].mxu0 %v5788_v20  ;;  %v5796_v20 = vunpack.c.l.bf16 %v5052_v19 }
 0x259   : > { %3740 = vmatprep.mubr.f32.mxu0 %v5790_v55  ;;  %v5798_v55 = vunpack.c.h.bf16 %v5052_v19 }
 0x25c   : > { %3741 = vmatmul.mubr.f32.gmra.mrb[52].mxu0 %v5792_v60  ;;  %v5070_v60 = vld [vmem:[%s4743_s23 + $0xb0] sm:$0xff]  }
 0x25d   : > { %3743 = vmatprep.mubr.f32.mxu0 %v5793_v62  ;;  %v5800_v62 = vunpack.c.h.bf16 %v5061_v17  ;;  %v5801_v10 = vunpack.c.l.bf16 %v5070_v60 }
 0x260   : > { %3744 = vmatmul.mubr.f32.gmra.mrb[54].mxu0 %v5795_v3  ;;  %v5079_v3 = vld [vmem:[%s4743_s23 + $0xb8] sm:$0xff]  }
 0x261   : > { %3746 = vmatprep.mubr.f32.mxu0 %v5796_v20  ;;  %v5803_v20 = vunpack.c.h.bf16 %v5070_v60  ;;  %v5805_v6 = vunpack.c.l.bf16 %v5079_v3 }
 0x264   : > { %3747 = vmatmul.mubr.f32.gmra.mrb[56].mxu0 %v5798_v55  ;;  %v5806_v55 = vunpack.c.h.bf16 %v5079_v3 }
 0x265   : > { %3749 = vmatprep.mubr.f32.mxu0 %v5799_v11 }
 0x268   : > { %3750 = vmatmul.mubr.f32.gmra.mrb[58].mxu0 %v5800_v62 }
 0x269   : > { %3752 = vmatprep.mubr.f32.mxu0 %v5801_v10 }
 0x26c   : > { %3753 = vmatmul.mubr.f32.gmra.mrb[60].mxu0 %v5803_v20 }
 0x26d   : > { %3755 = vmatprep.mubr.f32.mxu0 %v5805_v6 }
 0x270   : > { %3756 = vmatmul.mubr.f32.gmra.mrb[62].mxu0 %v5806_v55 }
 0x2e7   : > { %v3688_v11 = vpop.f32.mrb[16].mxu0 }
 0x2e8   : > { %1364 = vst.msk [vmem:[#allocation2 + $0x8] sm:$0xff] %vm735_vm1, %v3688_v11  ;;  %v1124_v62 = vpop.f32.mrb[17].mxu0 }
 0x2e9   : > { %1363 = vst.msk [vmem:[#allocation2] sm:$0xff] %vm735_vm1, %v1124_v62 }
 0x2eb   : > { %v3691_v10 = vpop.f32.mrb[18].mxu0 }
 0x2ec   : > { %1366 = vst.msk [vmem:[#allocation2 + $0x18] sm:$0xff] %vm735_vm1, %v3691_v10  ;;  %v1134_v5 = vpop.f32.mrb[19].mxu0 }
 0x2ed   : > { %1365 = vst.msk [vmem:[#allocation2 + $0x10] sm:$0xff] %vm735_vm1, %v1134_v5 }
 0x2ef   : > { %v3694_v20 = vpop.f32.mrb[20].mxu0 }
 0x2f0   : > { %1368 = vst.msk [vmem:[#allocation2 + $0x28] sm:$0xff] %vm735_vm1, %v3694_v20  ;;  %v1144_v2 = vpop.f32.mrb[21].mxu0 }
 0x2f1   : > { %1367 = vst.msk [vmem:[#allocation2 + $0x20] sm:$0xff] %vm735_vm1, %v1144_v2 }
 0x2f3   : > { %v3697_v6 = vpop.f32.mrb[22].mxu0 }
 0x2f4   : > { %1370 = vst.msk [vmem:[#allocation2 + $0x38] sm:$0xff] %vm735_vm1, %v3697_v6  ;;  %v1154_v55 = vpop.f32.mrb[23].mxu0 }
 0x2f5   : > { %1369 = vst.msk [vmem:[#allocation2 + $0x30] sm:$0xff] %vm735_vm1, %v1154_v55 }
 0x2f7   : > { %v3700_v11 = vpop.f32.mrb[24].mxu0 }
 0x2f8   : > { %1372 = vst.msk [vmem:[#allocation2 + $0x48] sm:$0xff] %vm735_vm1, %v3700_v11  ;;  %v1164_v62 = vpop.f32.mrb[25].mxu0  ;;  %v1557_v11 = vld [vmem:[#allocation3] sm:$0xff] }
 0x2f9   : > { %1371 = vst.msk [vmem:[#allocation2 + $0x40] sm:$0xff] %vm735_vm1, %v1164_v62  ;;  %v1558_v62 = vld [vmem:[#allocation3 + $0x8] sm:$0xff] }
 0x2fa   : > { %v4161_v1 = vpack.c.bf16 %v1558_v62, %v1557_v11 }
 0x2fb   : > { %v3703_v10 = vpop.f32.mrb[26].mxu0 }
 0x2fc   : > { %1374 = vst.msk [vmem:[#allocation2 + $0x58] sm:$0xff] %vm735_vm1, %v3703_v10  ;;  %v1174_v5 = vpop.f32.mrb[27].mxu0  ;;  %4162 = vmatprep.subr.bf16.mxu1 %v4161_v1 }
 0x2fd   : > { %1373 = vst.msk [vmem:[#allocation2 + $0x50] sm:$0xff] %vm735_vm1, %v1174_v5  ;;  %4164 = vmatpush3.bf16.msra.mxu1 %v4161_v1  ;;  %v1559_v5 = vld [vmem:[#allocation3 + $0x10] sm:$0xff] }
 0x2fe   : > { %v1563_v1 = vld [vmem:[#allocation3 + $0x30] sm:$0xff] }
 0x2ff   : > { %v3706_v20 = vpop.f32.mrb[28].mxu0 }
 0x300   : > { %1376 = vst.msk [vmem:[#allocation2 + $0x68] sm:$0xff] %vm735_vm1, %v3706_v20  ;;  %v1184_v2 = vpop.f32.mrb[29].mxu0  ;;  %v1560_v20 = vld [vmem:[#allocation3 + $0x18] sm:$0xff] }
 0x301   : > { %1375 = vst.msk [vmem:[#allocation2 + $0x60] sm:$0xff] %vm735_vm1, %v1184_v2  ;;  %v4165_v58 = vpack.c.bf16 %v1560_v20, %v1559_v5  ;;  %v1564_v5 = vld [vmem:[#allocation3 + $0x38] sm:$0xff] }
 0x302   : > { %v4173_v20 = vpack.c.bf16 %v1564_v5, %v1563_v1  ;;  %v1568_v1 = vld [vmem:[#allocation3 + $0x58] sm:$0xff] }
 0x303   : > { %v3709_v6 = vpop.f32.mrb[30].mxu0  ;;  %4166 = vmatprep.subr.bf16.mxu1 %v4165_v58 }
 0x304   : > { %1378 = vst.msk [vmem:[#allocation2 + $0x78] sm:$0xff] %vm735_vm1, %v3709_v6  ;;  %v1194_v55 = vpop.f32.mrb[31].mxu0  ;;  %4168 = vmatpush3.bf16.msra.mxu1 %v4165_v58  ;;  %v1565_v58 = vld [vmem:[#allocation3 + $0x40] sm:$0xff] }
 0x305   : > { %1377 = vst.msk [vmem:[#allocation2 + $0x70] sm:$0xff] %vm735_vm1, %v1194_v55  ;;  %v1561_v55 = vld [vmem:[#allocation3 + $0x20] sm:$0xff] }
 0x306   : > { %v4169_v11 = vpack.c.bf16 %v1562_v52, %v1561_v55  ;;  %v1566_v52 = vld [vmem:[#allocation3 + $0x48] sm:$0xff] }
 0x307   : > { %v3712_v59 = vpop.f32.mrb[32].mxu0  ;;  %v4177_v55 = vpack.c.bf16 %v1566_v52, %v1565_v58  ;;  %v1570_v58 = vld [vmem:[#allocation3 + $0x68] sm:$0xff] }
 0x308   : > { %1397 = vrot.lane.b32.xlu0 %v3712_v59, %s4503_s17  ;;  %v1204_v10 = vpop.f32.mrb[33].mxu0  ;;  %4170 = vmatprep.subr.bf16.mxu1 %v4169_v11 }
 0x309   : > { %4172 = vmatpush3.bf16.msra.mxu1 %v4169_v11  ;;  %v1567_v11 = vld [vmem:[#allocation3 + $0x50] sm:$0xff] }
 0x30a   : > { %4174 = vmatprep.subr.bf16.mxu1 %v4173_v20  ;;  %v4181_v5 = vpack.c.bf16 %v1568_v1, %v1567_v11  ;;  %v1572_v11 = vld [vmem:[#allocation3 + $0x78] sm:$0xff] }
 0x30b   : > { %v3715_v2 = vpop.f32.mrb[34].mxu0 }
 0x30c   : > { %1395 = vrot.lane.b32.xlu0 %v1204_v10, %s4503_s17  ;;  %1401 = vrot.lane.b32.xlu1 %v3715_v2, %s4503_s17  ;;  %v1214_v6 = vpop.f32.mrb[35].mxu0 }
 0x30d   : > { %4176 = vmatpush3.bf16.msra.mxu1 %v4173_v20  ;;  %v1569_v20 = vld [vmem:[#allocation3 + $0x60] sm:$0xff] }
 0x30e   : > { %4178 = vmatprep.subr.bf16.mxu1 %v4177_v55  ;;  %v4185_v52 = vpack.c.bf16 %v1570_v58, %v1569_v20 }
 0x30f   : > { %v3718_v62 = vpop.f32.mrb[36].mxu0 }
 0x310   : > { %1399 = vrot.lane.b32.xlu0 %v1214_v6, %s4503_s17  ;;  %1405 = vrot.lane.b32.xlu1 %v3718_v62, %s4503_s17  ;;  %v1224_v59 = vpop.f32.mrb[37].mxu0 }
 0x311   : > { %4180 = vmatpush3.bf16.msra.mxu1 %v4177_v55  ;;  %v1571_v55 = vld [vmem:[#allocation3 + $0x70] sm:$0xff] }
 0x312   : > { %4182 = vmatprep.subr.bf16.mxu1 %v4181_v5  ;;  %v4189_v1 = vpack.c.bf16 %v1572_v11, %v1571_v55 }
 0x313   : > { %v3721_v10 = vpop.f32.mrb[38].mxu0 }
 0x314   : > { %1403 = vrot.lane.b32.xlu0 %v1224_v59, %s4503_s17  ;;  %1409 = vrot.lane.b32.xlu1 %v3721_v10, %s4503_s17  ;;  %v1234_v2 = vpop.f32.mrb[39].mxu0 }
 0x315   : > { %4184 = vmatpush3.bf16.msra.mxu1 %v4181_v5 }
 0x316   : > { %4186 = vmatprep.subr.bf16.mxu1 %v4185_v52 }
 0x317   : > { %v3724_v6 = vpop.f32.mrb[40].mxu0 }
 0x318   : > { %1407 = vrot.lane.b32.xlu0 %v1234_v2, %s4503_s17  ;;  %1413 = vrot.lane.b32.xlu1 %v3724_v6, %s4503_s17  ;;  %v1244_v62 = vpop.f32.mrb[41].mxu0 }
 0x319   : > { %4188 = vmatpush3.bf16.msra.mxu1 %v4185_v52 }
 0x31a   : > { %4190 = vmatprep.subr.bf16.mxu1 %v4189_v1 }
 0x31b   : > { %v3727_v59 = vpop.f32.mrb[42].mxu0 }
 0x31c   : > { %1411 = vrot.lane.b32.xlu0 %v1244_v62, %s4503_s17  ;;  %1417 = vrot.lane.b32.xlu1 %v3727_v59, %s4503_s17  ;;  %v1254_v10 = vpop.f32.mrb[43].mxu0 }
 0x31d   : > { %4192 = vmatpush3.bf16.msra.mxu1 %v4189_v1 }
 0x31f   : > { %v3730_v2 = vpop.f32.mrb[44].mxu0 }
 0x320   : > { %1415 = vrot.lane.b32.xlu0 %v1254_v10, %s4503_s17  ;;  %1421 = vrot.lane.b32.xlu1 %v3730_v2, %s4503_s17  ;;  %v1264_v6 = vpop.f32.mrb[45].mxu0 }
 0x323   : > { %v3733_v62 = vpop.f32.mrb[46].mxu0 }
 0x324   : > { %1419 = vrot.lane.b32.xlu0 %v1264_v6, %s4503_s17  ;;  %v1274_v59 = vpop.f32.mrb[47].mxu0 }
 0x327   : > { %v3736_v51 = vpop.f32.mrb[48].mxu0 }
 0x328   : > { %1423 = vrot.lane.b32.xlu0 %v1274_v59, %s4503_s17  ;;  %1478 = vrot.lane.b32.xlu1 %v3736_v51, %s4504_s24  ;;  %v1284_v5 = vpop.f32.mrb[49].mxu0 }
 0x32b   : > { %v3739_v10 = vpop.f32.mrb[50].mxu0 }
 0x32c   : > { %1476 = vrot.lane.b32.xlu1 %v1284_v5, %s4504_s24  ;;  %v1294_v20 = vpop.f32.mrb[51].mxu0 }
 0x32d   : > { %1480 = vrot.lane.b32.xlu0 %v1294_v20, %s4504_s24  ;;  %v1765_v20 = vld [vmem:[%s5748_s10] sm:$0xff] }
 0x32f   : > { %v3742_v58 = vpop.f32.mrb[52].mxu0 }
 0x330   : > { %1425 = vrot.lane.b32.xlu1 %v3733_v62, %s4503_s17  ;;  %v1304_v52 = vpop.f32.mrb[53].mxu0 }
 0x331   : > { %1484 = vrot.lane.b32.xlu0 %v1304_v52, %s4504_s24 }
 0x333   : > { %v3745_v2 = vpop.f32.mrb[54].mxu0 }
 0x334   : > { %1482 = vrot.lane.b32.xlu1 %v3739_v10, %s4504_s24  ;;  %v1314_v6 = vpop.f32.mrb[55].mxu0 }
 0x335   : > { %1488 = vrot.lane.b32.xlu0 %v1314_v6, %s4504_s24 }
 0x337   : > { %v3748_v51 = vpop.f32.mrb[56].mxu0 }
 0x338   : > { %1486 = vrot.lane.b32.xlu1 %v3742_v58, %s4504_s24  ;;  %v1324_v55 = vpop.f32.mrb[57].mxu0  ;;  %v1766_v58 = vld [vmem:[%s5748_s10 + $0x8] sm:$0xff] }
 0x339   : > { %1492 = vrot.lane.b32.xlu0 %v1324_v55, %s4504_s24  ;;  %v4193_v52 = vpack.c.bf16 %v1766_v58, %v1765_v20 }
 0x33b   : > { %v3751_v11 = vpop.f32.mrb[58].mxu0  ;;  %4194 = vmatprep.subr.bf16.mxu1 %v4193_v52 }
 0x33c   : > { %1490 = vrot.lane.b32.xlu1 %v3745_v2, %s4504_s24  ;;  %v1334_v1 = vpop.f32.mrb[59].mxu0 }
 0x33d   : > { %1496 = vrot.lane.b32.xlu0 %v1334_v1, %s4504_s24 }
 0x33f   : > { %v3754_v62 = vpop.f32.mrb[60].mxu0 }
 0x340   : > { %1494 = vrot.lane.b32.xlu1 %v3748_v51, %s4504_s24  ;;  %v1344_v59 = vpop.f32.mrb[61].mxu0 }
 0x341   : > { %1500 = vrot.lane.b32.xlu0 %v1344_v59, %s4504_s24 }
 0x343   : > { %v3757_v5 = vpop.f32.mrb[62].mxu0 }
 0x344   : > { %1498 = vrot.lane.b32.xlu1 %v3751_v11, %s4504_s24  ;;  %v1354_v10 = vpop.f32.mrb[63].mxu0 }
 0x345   : > { %1504 = vrot.lane.b32.xlu0 %v1354_v10, %s4504_s24 }
 0x348   : > { %1502 = vrot.lane.b32.xlu1 %v3754_v62, %s4504_s24 }
 0x34c   : > { %1506 = vrot.lane.b32.xlu1 %v3757_v5, %s4504_s24 }
 0x37a   : > { %v1398_v2 = vpop.permute.xlu0 %1397 }
 0x37b   : > { %1445 = vst.msk [vmem:[#allocation2 + $0x8] sm:$0xff] %vm1443_vm3, %v1398_v2 }
 0x37e   : > { %v1396_v6 = vpop.permute.xlu0 %1395  ;;  %v1402_v51 = vpop.permute.xlu1 %1401 }
 0x37f   : > { %1444 = vst.msk [vmem:[#allocation2] sm:$0xff] %vm1443_vm3, %v1396_v6  ;;  %1447 = vst.msk [vmem:[#allocation2 + $0x18] sm:$0xff] %vm1443_vm3, %v1402_v51 }
 0x382   : > { %v1400_v55 = vpop.permute.xlu0 %1399  ;;  %v1406_v11 = vpop.permute.xlu1 %1405 }
 0x383   : > { %1446 = vst.msk [vmem:[#allocation2 + $0x10] sm:$0xff] %vm1443_vm3, %v1400_v55  ;;  %1449 = vst.msk [vmem:[#allocation2 + $0x28] sm:$0xff] %vm1443_vm3, %v1406_v11 }
 0x386   : > { %v1404_v1 = vpop.permute.xlu0 %1403  ;;  %v1410_v62 = vpop.permute.xlu1 %1409 }
 0x387   : > { %1448 = vst.msk [vmem:[#allocation2 + $0x20] sm:$0xff] %vm1443_vm3, %v1404_v1  ;;  %1451 = vst.msk [vmem:[#allocation2 + $0x38] sm:$0xff] %vm1443_vm3, %v1410_v62 }
 0x38a   : > { %v1408_v59 = vpop.permute.xlu0 %1407  ;;  %v1414_v5 = vpop.permute.xlu1 %1413 }
 0x38b   : > { %1450 = vst.msk [vmem:[#allocation2 + $0x30] sm:$0xff] %vm1443_vm3, %v1408_v59  ;;  %1453 = vst.msk [vmem:[#allocation2 + $0x48] sm:$0xff] %vm1443_vm3, %v1414_v5  ;;  %v1767_v5 = vld [vmem:[%s5748_s10 + $0x10] sm:$0xff] }
 0x38e   : > { %v1412_v10 = vpop.permute.xlu0 %1411  ;;  %v1418_v20 = vpop.permute.xlu1 %1417 }
 0x38f   : > { %1452 = vst.msk [vmem:[#allocation2 + $0x40] sm:$0xff] %vm1443_vm3, %v1412_v10  ;;  %1455 = vst.msk [vmem:[#allocation2 + $0x58] sm:$0xff] %vm1443_vm3, %v1418_v20  ;;  %v1768_v10 = vld [vmem:[%s5748_s10 + $0x18] sm:$0xff] }
 0x392   : > { %v1416_v58 = vpop.permute.xlu0 %1415  ;;  %v1422_v2 = vpop.permute.xlu1 %1421 }
 0x393   : > { %1454 = vst.msk [vmem:[#allocation2 + $0x50] sm:$0xff] %vm1443_vm3, %v1416_v58  ;;  %1457 = vst.msk [vmem:[#allocation2 + $0x68] sm:$0xff] %vm1443_vm3, %v1422_v2  ;;  %v4197_v2 = vpack.c.bf16 %v1768_v10, %v1767_v5  ;;  %v1771_v10 = vld [vmem:[%s5748_s10 + $0x30] sm:$0xff] }
 0x396   : > { %v1420_v6 = vpop.permute.xlu0 %1419 }
 0x397   : > { %1456 = vst.msk [vmem:[#allocation2 + $0x60] sm:$0xff] %vm1443_vm3, %v1420_v6  ;;  %v1769_v6 = vld [vmem:[%s5748_s10 + $0x20] sm:$0xff] }
 0x39a   : > { %v1424_v51 = vpop.permute.xlu0 %1423  ;;  %v1479_v55 = vpop.permute.xlu1 %1478 }
 0x39b   : > { %1458 = vst.msk [vmem:[#allocation2 + $0x70] sm:$0xff] %vm1443_vm3, %v1424_v51 }
 0x39c   : > { %1526 = vst.msk [vmem:[#allocation2 + $0x8] sm:$0xff] %vm1524_vm4, %v1479_v55 }
 0x39e   : > { %v1477_v11 = vpop.permute.xlu1 %1476 }
 0x39f   : > { %1525 = vst.msk [vmem:[#allocation2] sm:$0xff] %vm1524_vm4, %v1477_v11  ;;  %v1481_v1 = vpop.permute.xlu0 %1480 }
 0x3a0   : > { %1527 = vst.msk [vmem:[#allocation2 + $0x10] sm:$0xff] %vm1524_vm4, %v1481_v1  ;;  %v1770_v1 = vld [vmem:[%s5748_s10 + $0x28] sm:$0xff] }
 0x3a2   : > { %v1426_v62 = vpop.permute.xlu1 %1425 }
 0x3a3   : > { %1459 = vst.msk [vmem:[#allocation2 + $0x78] sm:$0xff] %vm1443_vm3, %v1426_v62  ;;  %v1485_v59 = vpop.permute.xlu0 %1484  ;;  %v1542_v51 = vld [vmem:[#allocation2 + $0x8] sm:$0xff] }
 0x3a4   : > { %1529 = vst.msk [vmem:[#allocation2 + $0x20] sm:$0xff] %vm1524_vm4, %v1485_v59  ;;  %v4201_v59 = vpack.c.bf16 %v1770_v1, %v1769_v6  ;;  %v1774_v1 = vld [vmem:[%s5748_s10 + $0x48] sm:$0xff] }
 0x3a6   : > { %v1483_v20 = vpop.permute.xlu1 %1482  ;;  %v1541_v58 = vld [vmem:[#allocation2] sm:$0xff] }
 0x3a7   : > { %1528 = vst.msk [vmem:[#allocation2 + $0x18] sm:$0xff] %vm1524_vm4, %v1483_v20  ;;  %3790 = vmatprep.mubr.f32.mxu1 %v1541_v58  ;;  %v1489_v55 = vpop.permute.xlu0 %1488  ;;  %v1543_v11 = vld [vmem:[#allocation2 + $0x10] sm:$0xff]  ;;  %v1772_v20 = vld [vmem:[%s5748_s10 + $0x38] sm:$0xff] }
 0x3a8   : > { %3791 = vmatmul.mubr.f32.vlgmr.msra.gmra.mrb[16].mxu1 %v1542_v51  ;;  %1531 = vst.msk [vmem:[#allocation2 + $0x30] sm:$0xff] %vm1524_vm4, %v1489_v55  ;;  %v4205_v55 = vpack.c.bf16 %v1772_v20, %v1771_v10 }
 0x3a9   : > { %3793 = vmatprep.mubr.f32.mxu1 %v1543_v11  ;;  %4196 = vmatpush3.bf16.msra.mxu1 %v4193_v52  ;;  %v1773_v11 = vld [vmem:[%s5748_s10 + $0x40] sm:$0xff] }
 0x3aa   : > { %v1487_v62 = vpop.permute.xlu1 %1486  ;;  %4198 = vmatprep.subr.bf16.mxu1 %v4197_v2  ;;  %v4209_v10 = vpack.c.bf16 %v1774_v1, %v1773_v11 }
 0x3ab   : > { %1530 = vst.msk [vmem:[#allocation2 + $0x28] sm:$0xff] %vm1524_vm4, %v1487_v62  ;;  %v1493_v5 = vpop.permute.xlu0 %1492  ;;  %v1545_v58 = vld [vmem:[#allocation2 + $0x20] sm:$0xff] }
 0x3ac   : > { %1533 = vst.msk [vmem:[#allocation2 + $0x40] sm:$0xff] %vm1524_vm4, %v1493_v5 }
 0x3ad   : > { %4200 = vmatpush3.bf16.msra.mxu1 %v4197_v2 }
 0x3ae   : > { %v1491_v51 = vpop.permute.xlu1 %1490  ;;  %v1544_v52 = vld [vmem:[#allocation2 + $0x18] sm:$0xff]  ;;  %4202 = vmatprep.subr.bf16.mxu1 %v4201_v59 }
 0x3af   : > { %1532 = vst.msk [vmem:[#allocation2 + $0x38] sm:$0xff] %vm1524_vm4, %v1491_v51  ;;  %3794 = vmatmul.mubr.f32.gmra.mrb[18].mxu1 %v1544_v52  ;;  %v1497_v6 = vpop.permute.xlu0 %1496  ;;  %v1547_v2 = vld [vmem:[#allocation2 + $0x30] sm:$0xff] }
 0x3b0   : > { %3796 = vmatprep.mubr.f32.mxu1 %v1545_v58  ;;  %1535 = vst.msk [vmem:[#allocation2 + $0x50] sm:$0xff] %vm1524_vm4, %v1497_v6  ;;  %v1775_v51 = vld [vmem:[%s5748_s10 + $0x50] sm:$0xff]  ;;  %v1776_v58 = vld [vmem:[%s5748_s10 + $0x58] sm:$0xff] }
 0x3b1   : > { %4204 = vmatpush3.bf16.msra.mxu1 %v4201_v59  ;;  %v4213_v11 = vpack.c.bf16 %v1776_v58, %v1775_v51 }
 0x3b2   : > { %v1495_v62 = vpop.permute.xlu1 %1494  ;;  %v1546_v5 = vld [vmem:[#allocation2 + $0x28] sm:$0xff]  ;;  %4206 = vmatprep.subr.bf16.mxu1 %v4205_v55 }
 0x3b3   : > { %1534 = vst.msk [vmem:[#allocation2 + $0x48] sm:$0xff] %vm1524_vm4, %v1495_v62  ;;  %3797 = vmatmul.mubr.f32.gmra.mrb[20].mxu1 %v1546_v5  ;;  %v1501_v20 = vpop.permute.xlu0 %1500  ;;  %v1549_v59 = vld [vmem:[#allocation2 + $0x40] sm:$0xff] }
 0x3b4   : > { %3799 = vmatprep.mubr.f32.mxu1 %v1547_v2  ;;  %1537 = vst.msk [vmem:[#allocation2 + $0x60] sm:$0xff] %vm1524_vm4, %v1501_v20  ;;  %v1777_v62 = vld [vmem:[%s5748_s10 + $0x60] sm:$0xff]  ;;  %v1778_v2 = vld [vmem:[%s5748_s10 + $0x68] sm:$0xff] }
 0x3b5   : > { %4208 = vmatpush3.bf16.msra.mxu1 %v4205_v55  ;;  %v4217_v51 = vpack.c.bf16 %v1778_v2, %v1777_v62  ;;  %v1779_v62 = vld [vmem:[%s5748_s10 + $0x70] sm:$0xff] }
 0x3b6   : > { %v1499_v52 = vpop.permute.xlu1 %1498  ;;  %v1548_v6 = vld [vmem:[#allocation2 + $0x38] sm:$0xff]  ;;  %4210 = vmatprep.subr.bf16.mxu1 %v4209_v10 }
 0x3b7   : > { %1536 = vst.msk [vmem:[#allocation2 + $0x58] sm:$0xff] %vm1524_vm4, %v1499_v52  ;;  %3800 = vmatmul.mubr.f32.gmra.mrb[22].mxu1 %v1548_v6  ;;  %v1505_v1 = vpop.permute.xlu0 %1504  ;;  %v1551_v55 = vld [vmem:[#allocation2 + $0x50] sm:$0xff] }
 0x3b8   : > { %3802 = vmatprep.mubr.f32.mxu1 %v1549_v59  ;;  %1539 = vst.msk [vmem:[#allocation2 + $0x70] sm:$0xff] %vm1524_vm4, %v1505_v1 }
 0x3b9   : > { %4212 = vmatpush3.bf16.msra.mxu1 %v4209_v10 }
 0x3ba   : > { %v1503_v5 = vpop.permute.xlu1 %1502  ;;  %v1550_v20 = vld [vmem:[#allocation2 + $0x48] sm:$0xff]  ;;  %4214 = vmatprep.subr.bf16.mxu1 %v4213_v11 }
 0x3bb   : > { %1538 = vst.msk [vmem:[#allocation2 + $0x68] sm:$0xff] %vm1524_vm4, %v1503_v5  ;;  %3803 = vmatmul.mubr.f32.gmra.mrb[24].mxu1 %v1550_v20  ;;  %v1553_v58 = vld [vmem:[#allocation2 + $0x60] sm:$0xff] }
 0x3bc   : > { %3805 = vmatprep.mubr.f32.mxu1 %v1551_v55  ;;  %v3140_v55 = vld [vmem:[%s5747_s9] ss:$0 sm:$0xff] }
 0x3bd   : > { %4216 = vmatpush3.bf16.msra.mxu1 %v4213_v11  ;;  %v1780_v11 = vld [vmem:[%s5748_s10 + $0x78] sm:$0xff] }
 0x3be   : > { %v1507_v52 = vpop.permute.xlu1 %1506  ;;  %v1552_v6 = vld [vmem:[#allocation2 + $0x58] sm:$0xff]  ;;  %4218 = vmatprep.subr.bf16.mxu1 %v4217_v51  ;;  %v4221_v2 = vpack.c.bf16 %v1780_v11, %v1779_v62 }
 0x3bf   : > { %1540 = vst.msk [vmem:[#allocation2 + $0x78] sm:$0xff] %vm1524_vm4, %v1507_v52  ;;  %3806 = vmatmul.mubr.f32.gmra.mrb[26].mxu1 %v1552_v6  ;;  %v1555_v59 = vld [vmem:[#allocation2 + $0x70] sm:$0xff] }
 0x3c0   : > { %3808 = vmatprep.mubr.f32.mxu1 %v1553_v58 }
 0x3c1   : > { %4220 = vmatpush3.bf16.msra.mxu1 %v4217_v51 }
 0x3c2   : > { %v1554_v10 = vld [vmem:[#allocation2 + $0x68] sm:$0xff]  ;;  %4222 = vmatprep.subr.bf16.mxu1 %v4221_v2 }
 0x3c3   : > { %3809 = vmatmul.mubr.f32.gmra.mrb[28].mxu1 %v1554_v10 }
 0x3c4   : > { %3811 = vmatprep.mubr.f32.mxu1 %v1555_v59 }
 0x3c5   : > { %4224 = vmatpush3.bf16.msra.mxu1 %v4221_v2 }
 0x3c6   : > { %v1556_v1 = vld [vmem:[#allocation2 + $0x78] sm:$0xff] }
 0x3c7   : > { %3812 = vmatmul.mubr.f32.gmra.mrb[30].mxu1 %v1556_v1 }
 0x47b   : > { %v3792_v5 = vpop.f32.mrb[16].mxu1 }
 0x47c   : > { %v1652_v20 = vadd.f32 %v3792_v5, %v3140_v55  ;;  %v1646_v51 = vpop.f32.mrb[17].mxu1 }
 0x47d   : > { %v1647_v58 = vadd.f32 %v3140_v55, %v1646_v51 }
 0x47e   : > { %v1726_v6 = vmax.f32 %v1652_v20, 0.0 }
 0x47f   : > { %v1725_v52 = vmax.f32 %v1647_v58, 0.0 }
 0x481   : > { %3846 = vmatprep.mubr.f32.mxu1 %v1725_v52 }
 0x482   : > { %v3795_v59 = vpop.f32.mrb[18].mxu1  ;;  %3847 = vmatmul.mubr.f32.vlgmr.msra.gmra.mrb[32].mxu1 %v1726_v6 }
 0x483   : > { %v1662_v10 = vadd.f32 %v3795_v59, %v3140_v55  ;;  %v1656_v1 = vpop.f32.mrb[19].mxu1 }
 0x484   : > { %v1657_v45 = vadd.f32 %v3140_v55, %v1656_v1 }
 0x485   : > { %v1728_v11 = vmax.f32 %v1662_v10, 0.0 }
 0x486   : > { %v1727_v44 = vmax.f32 %v1657_v45, 0.0  ;;  %v3798_v62 = vpop.f32.mrb[20].mxu1 }
 0x487   : > { %v1672_v2 = vadd.f32 %v3798_v62, %v3140_v55  ;;  %v1666_v38 = vpop.f32.mrb[21].mxu1 }
 0x488   : > { %v1667_v37 = vadd.f32 %v3140_v55, %v1666_v38  ;;  %3849 = vmatprep.mubr.f32.mxu1 %v1727_v44 }
 0x489   : > { %3850 = vmatmul.mubr.f32.gmra.mrb[34].mxu1 %v1728_v11  ;;  %v1730_v30 = vmax.f32 %v1672_v2, 0.0 }
 0x48a   : > { %v1729_v31 = vmax.f32 %v1667_v37, 0.0  ;;  %v3801_v5 = vpop.f32.mrb[22].mxu1 }
 0x48b   : > { %v1682_v51 = vadd.f32 %v3801_v5, %v3140_v55  ;;  %v1676_v58 = vpop.f32.mrb[23].mxu1 }
 0x48c   : > { %v1677_v20 = vadd.f32 %v3140_v55, %v1676_v58  ;;  %3852 = vmatprep.mubr.f32.mxu1 %v1729_v31 }
 0x48d   : > { %3853 = vmatmul.mubr.f32.gmra.mrb[36].mxu1 %v1730_v30  ;;  %v1732_v59 = vmax.f32 %v1682_v51, 0.0 }
 0x48e   : > { %v1731_v52 = vmax.f32 %v1677_v20, 0.0  ;;  %v3804_v6 = vpop.f32.mrb[24].mxu1 }
 0x48f   : > { %v1692_v1 = vadd.f32 %v3804_v6, %v3140_v55  ;;  %v1686_v45 = vpop.f32.mrb[25].mxu1 }
 0x490   : > { %v1687_v24 = vadd.f32 %v3140_v55, %v1686_v45  ;;  %3855 = vmatprep.mubr.f32.mxu1 %v1731_v52 }
 0x491   : > { %3856 = vmatmul.mubr.f32.gmra.mrb[38].mxu1 %v1732_v59  ;;  %v1734_v44 = vmax.f32 %v1692_v1, 0.0 }
 0x492   : > { %v1733_v10 = vmax.f32 %v1687_v24, 0.0  ;;  %v3807_v38 = vpop.f32.mrb[26].mxu1 }
 0x493   : > { %v1702_v62 = vadd.f32 %v3807_v38, %v3140_v55  ;;  %v1696_v37 = vpop.f32.mrb[27].mxu1 }
 0x494   : > { %v1697_v11 = vadd.f32 %v3140_v55, %v1696_v37  ;;  %3858 = vmatprep.mubr.f32.mxu1 %v1733_v10  ;;  %v1744_v10 = vlaneseq }
 0x495   : > { %3859 = vmatmul.mubr.f32.gmra.mrb[40].mxu1 %v1734_v44  ;;  %v1736_v31 = vmax.f32 %v1702_v62, 0.0  ;;  %v1741_v62 = vld [vmem:[%s5745_s7] sm:$0x1] }
 0x496   : > { %v1735_v2 = vmax.f32 %v1697_v11, 0.0  ;;  %v3810_v5 = vpop.f32.mrb[28].mxu1  ;;  %v5227_v44 = vshrl.u32 %v1744_v10, 7  ;;  %v1742_v37 = vadd.f32 1.0, %v1741_v62 }
 0x497   : > { %v1712_v30 = vadd.f32 %v3810_v5, %v3140_v55  ;;  %v1706_v58 = vpop.f32.mrb[29].mxu1 }
 0x498   : > { %v1707_v20 = vadd.f32 %v3140_v55, %v1706_v58  ;;  %3861 = vmatprep.mubr.f32.mxu1 %v1735_v2  ;;  %v1746_v11 = vsub.s32 0, %v5227_v44 }
 0x499   : > { %3862 = vmatmul.mubr.f32.gmra.mrb[42].mxu1 %v1736_v31  ;;  %v1738_v52 = vmax.f32 %v1712_v30, 0.0 }
 0x49a   : > { %v1737_v51 = vmax.f32 %v1707_v20, 0.0  ;;  %v3813_v6 = vpop.f32.mrb[30].mxu1 }
 0x49b   : > { %v1722_v59 = vadd.f32 %v3813_v6, %v3140_v55  ;;  %v1716_v24 = vpop.f32.mrb[31].mxu1 }
 0x49c   : > { %v1717_v45 = vadd.f32 %v3140_v55, %v1716_v24  ;;  %3864 = vmatprep.mubr.f32.mxu1 %v1737_v51  ;;  %v5235_v55 = vrot.slane %v1742_v37, %v1746_v11 }
 0x49d   : > { %3865 = vmatmul.mubr.f32.gmra.mrb[44].mxu1 %v1738_v52  ;;  %v1740_v38 = vmax.f32 %v1722_v59, 0.0 }
 0x49e   : > { %v1739_v1 = vmax.f32 %v1717_v45, 0.0  ;;  %v1750_v2 = vmul.f32 %v5235_v55, %v930_v15  ;;  %v1749_v31 = vmul.f32 %v5235_v55, %v929_v16  ;;  %v1752_v15 = vmul.f32 %v5235_v55, %v932_v23 }
 0x49f   : > { %v1751_v16 = vmul.f32 %v5235_v55, %v5829_v14  ;;  %v1754_v23 = vmul.f32 %v5235_v55, %v5830_v18  ;;  %v1753_v62 = vmul.f32 %v5235_v55, %v5831_v22 }
 0x4a0   : > { %3867 = vmatprep.mubr.f32.mxu1 %v1739_v1 }
 0x4a1   : > { %3868 = vmatmul.mubr.f32.gmra.mrb[46].mxu1 %v1740_v38 }
 0x4a2   : > { %3902 = vmatprep.mubr.f32.mxu1 %v3169_v9  ;;  %v5243_v9 = vld [vmem:[%s5749_s11] ss:$0 sm:$0xff] }
 0x555   : > { %v3848_v5 = vpop.f32.mrb[32].mxu1 }
 0x556   : > { %v1927_v30 = vadd.f32 %v3848_v5, %v1750_v2  ;;  %v1847_v58 = vpop.f32.mrb[33].mxu1 }
 0x557   : > { %v1926_v20 = vadd.f32 %v1847_v58, %v1749_v31  ;;  %v1756_v58 = vmul.f32 %v5235_v55, %v5832_v26 }
 0x558   : > { %v5249_v51 = vadd.f32 %v5243_v9, %v1927_v30 }
 0x559   : > { %v5252_v12 = vadd.f32 %v5243_v9, %v1926_v20 }
 0x55b   : > { %v4225_v6 = vpack.c.bf16 %v5249_v51, %v5252_v12 }
 0x55c   : > { %v3851_v52 = vpop.f32.mrb[34].mxu1 }
 0x55d   : > { %v1929_v59 = vadd.f32 %v3851_v52, %v1752_v15  ;;  %v1857_v24 = vpop.f32.mrb[35].mxu1  ;;  %4226 = vmatprep.subr.bf16.mxu1 %v4225_v6 }
 0x55e   : > { %v1928_v45 = vadd.f32 %v1857_v24, %v1751_v16  ;;  %4228 = vmatpush3.bf16.msra.mxu1 %v4225_v6  ;;  %v1755_v6 = vmul.f32 %v5235_v55, %v5833_v29  ;;  %v5834_v24 = vmax.f32 %v4833_v40, 0.0 }
 0x55f   : > { %v5263_v1 = vadd.f32 %v5243_v9, %v1929_v59 }
 0x560   : > { %v5269_v38 = vadd.f32 %v5243_v9, %v1928_v45  ;;  %v3854_v10 = vpop.f32.mrb[36].mxu1  ;;  %v1758_v45 = vmul.f32 %v5235_v55, %v5834_v24 }
 0x561   : > { %v1931_v37 = vadd.f32 %v3854_v10, %v1754_v23  ;;  %v1867_v2 = vpop.f32.mrb[37].mxu1  ;;  %v5835_v23 = vmax.f32 %v4840_v43, 0.0 }
 0x562   : > { %v1930_v5 = vadd.f32 %v1867_v2, %v1753_v62  ;;  %v4229_v31 = vpack.c.bf16 %v5263_v1, %v5269_v38 }
 0x563   : > { %v5277_v30 = vadd.f32 %v5243_v9, %v1931_v37  ;;  %v1757_v10 = vmul.f32 %v5235_v55, %v5835_v23 }
 0x564   : > { %v5283_v20 = vadd.f32 %v5243_v9, %v1930_v5  ;;  %v3857_v15 = vpop.f32.mrb[38].mxu1  ;;  %4230 = vmatprep.subr.bf16.mxu1 %v4229_v31  ;;  %v5836_v5 = vmax.f32 %v4845_v47, 0.0 }
 0x565   : > { %v1933_v52 = vadd.f32 %v3857_v15, %v1756_v58  ;;  %v1877_v14 = vpop.f32.mrb[39].mxu1  ;;  %4232 = vmatpush3.bf16.msra.mxu1 %v4229_v31  ;;  %v5837_v58 = vmax.f32 %v4852_v50, 0.0 }
 0x566   : > { %v1932_v16 = vadd.f32 %v1877_v14, %v1755_v6  ;;  %v4233_v59 = vpack.c.bf16 %v5277_v30, %v5283_v20  ;;  %v1760_v31 = vmul.f32 %v5235_v55, %v5836_v5 }
 0x567   : > { %v5291_v33 = vadd.f32 %v5243_v9, %v1933_v52  ;;  %v1759_v15 = vmul.f32 %v5235_v55, %v5837_v58 }
 0x568   : > { %v5297_v18 = vadd.f32 %v5243_v9, %v1932_v16  ;;  %v3860_v36 = vpop.f32.mrb[40].mxu1  ;;  %4234 = vmatprep.subr.bf16.mxu1 %v4233_v59  ;;  %v5838_v16 = vmax.f32 %v4857_v54, 0.0 }
 0x569   : > { %v1935_v22 = vadd.f32 %v3860_v36, %v1758_v45  ;;  %v1887_v62 = vpop.f32.mrb[41].mxu1  ;;  %4236 = vmatpush3.bf16.msra.mxu1 %v4233_v59  ;;  %v5839_v45 = vmax.f32 %v4864_v57, 0.0 }
 0x56a   : > { %v1934_v37 = vadd.f32 %v1887_v62, %v1757_v10  ;;  %v4237_v2 = vpack.c.bf16 %v5291_v33, %v5297_v18  ;;  %v1762_v59 = vmul.f32 %v5235_v55, %v5838_v16  ;;  %v5844_v16 = vunpack.c.h.bf16 %v4885_v4 }
 0x56b   : > { %v5305_v40 = vadd.f32 %v5243_v9, %v1935_v22  ;;  %v1761_v36 = vmul.f32 %v5235_v55, %v5839_v45  ;;  %v5848_v45 = vunpack.c.h.bf16 %v4899_v13 }
 0x56c   : > { %v5311_v26 = vadd.f32 %v5243_v9, %v1934_v37  ;;  %v3863_v43 = vpop.f32.mrb[42].mxu1  ;;  %4238 = vmatprep.subr.bf16.mxu1 %v4237_v2  ;;  %v5840_v37 = vmax.f32 %v4869_v61, 0.0 }
 0x56d   : > { %v1937_v29 = vadd.f32 %v3863_v43, %v1760_v31  ;;  %v1897_v6 = vpop.f32.mrb[43].mxu1  ;;  %4240 = vmatpush3.bf16.msra.mxu1 %v4237_v2  ;;  %v5841_v31 = vmax.f32 %v4876_v0, 0.0 }
 0x56e   : > { %v1936_v52 = vadd.f32 %v1897_v6, %v1759_v15  ;;  %v4241_v14 = vpack.c.bf16 %v5305_v40, %v5311_v26  ;;  %v1764_v2 = vmul.f32 %v5235_v55, %v5840_v37  ;;  %v5860_v37 = vunpack.c.h.bf16 %v4953_v56 }
 0x56f   : > { %v5319_v47 = vadd.f32 %v5243_v9, %v1937_v29  ;;  %v1763_v43 = vmul.f32 %v5235_v55, %v5841_v31  ;;  %v5842_v55 = vunpack.c.h.bf16 %v4746_v8  ;;  %v5849_v8 = vunpack.c.l.bf16 %v4908_v21 }
 0x570   : > { %v5325_v24 = vadd.f32 %v5243_v9, %v1936_v52  ;;  %v3866_v50 = vpop.f32.mrb[44].mxu1  ;;  %4242 = vmatprep.subr.bf16.mxu1 %v4241_v14  ;;  %v5866_v31 = vunpack.c.h.bf16 %v4980_v48 }
 0x571   : > { %v1939_v23 = vadd.f32 %v3866_v50, %v1762_v59  ;;  %v1907_v10 = vpop.f32.mrb[45].mxu1  ;;  %4244 = vmatpush3.bf16.msra.mxu1 %v4241_v14  ;;  %v5843_v14 = vunpack.c.l.bf16 %v4885_v4  ;;  %v5845_v59 = vunpack.c.l.bf16 %v4890_v7  ;;  %v5847_v50 = vunpack.c.l.bf16 %v4899_v13 }
 0x572   : > { %v1938_v22 = vadd.f32 %v1907_v10, %v1761_v36  ;;  %v4245_v62 = vpack.c.bf16 %v5319_v47, %v5325_v24  ;;  %v5850_v36 = vunpack.c.h.bf16 %v4908_v21  ;;  %v5851_v4 = vunpack.c.l.bf16 %v4917_v28 }
 0x573   : > { %v5333_v54 = vadd.f32 %v5243_v9, %v1939_v23  ;;  %v5852_v23 = vunpack.c.h.bf16 %v4917_v28  ;;  %v5854_v10 = vunpack.c.h.bf16 %v4926_v35  ;;  %v5855_v13 = vunpack.c.l.bf16 %v4935_v42 }
 0x574   : > { %v5339_v5 = vadd.f32 %v5243_v9, %v1938_v22  ;;  %v3869_v57 = vpop.f32.mrb[46].mxu1  ;;  %4246 = vmatprep.subr.bf16.mxu1 %v4245_v62  ;;  %v5856_v22 = vunpack.c.h.bf16 %v4935_v42  ;;  %v5857_v21 = vunpack.c.l.bf16 %v4944_v49  ;;  %v5859_v28 = vunpack.c.l.bf16 %v4953_v56 }
 0x575   : > { %v1941_v58 = vadd.f32 %v3869_v57, %v1764_v2  ;;  %v1917_v15 = vpop.f32.mrb[47].mxu1  ;;  %4248 = vmatpush3.bf16.msra.mxu1 %v4245_v62  ;;  %v5858_v62 = vunpack.c.h.bf16 %v4944_v49  ;;  %v5862_v2 = vunpack.c.h.bf16 %v4962_v63  ;;  %v5863_v42 = vunpack.c.l.bf16 %v4971_v53 }
 0x576   : > { %v1940_v29 = vadd.f32 %v1917_v15, %v1763_v43  ;;  %v4249_v6 = vpack.c.bf16 %v5333_v54, %v5339_v5  ;;  %v5864_v57 = vunpack.c.h.bf16 %v4971_v53  ;;  %v5865_v49 = vunpack.c.l.bf16 %v4980_v48 }
 0x577   : > { %v5347_v61 = vadd.f32 %v5243_v9, %v1941_v58  ;;  %v5867_v56 = vunpack.c.l.bf16 %v4989_v46  ;;  %v5868_v43 = vunpack.c.h.bf16 %v4989_v46  ;;  %v5870_v58 = vunpack.c.h.bf16 %v4998_v41 }
 0x578   : > { %v5350_v52 = vadd.f32 %v5243_v9, %v1940_v29  ;;  %4250 = vmatprep.subr.bf16.mxu1 %v4249_v6  ;;  %v5846_v9 = vunpack.c.h.bf16 %v4890_v7  ;;  %v5853_v7 = vunpack.c.l.bf16 %v4926_v35  ;;  %v5861_v35 = vunpack.c.l.bf16 %v4962_v63 }
 0x579   : > { %4252 = vmatpush3.bf16.msra.mxu1 %v4249_v6  ;;  %v5869_v63 = vunpack.c.l.bf16 %v4998_v41  ;;  %v5871_v53 = vunpack.c.l.bf16 %v5007_v39  ;;  %v5872_v15 = vunpack.c.h.bf16 %v5007_v39  ;;  %v5873_v48 = vunpack.c.l.bf16 %v5016_v34 }
 0x57a   : > { %v4253_v0 = vpack.c.bf16 %v5347_v61, %v5350_v52  ;;  %v5874_v29 = vunpack.c.h.bf16 %v5016_v34  ;;  %v5875_v46 = vunpack.c.l.bf16 %v5025_v32  ;;  %v5876_v6 = vunpack.c.h.bf16 %v5025_v32 }
 0x57b   : > { %v5877_v41 = vunpack.c.l.bf16 %v5034_v27  ;;  %v5879_v39 = vunpack.c.l.bf16 %v5043_v25  ;;  %v5881_v34 = vunpack.c.l.bf16 %v5052_v19  ;;  %v5883_v32 = vunpack.c.l.bf16 %v5061_v17 }
 0x57c   : > { %4254 = vmatprep.subr.bf16.mxu1 %v4253_v0 }
 0x57d   : > { %4256 = vmatpush3.bf16.msra.mxu1 %v4253_v0  ;;  %v5878_v0 = vunpack.c.h.bf16 %v5034_v27  ;;  %v5885_v27 = vunpack.c.l.bf16 %v5070_v60 }
 0x580   : > { %3903 = vmatmul.mubr.f32.vlgmr.msra.gmra.mrb[48].mxu1 %v5842_v55  ;;  %v5880_v55 = vunpack.c.h.bf16 %v5043_v25  ;;  %v5887_v25 = vunpack.c.l.bf16 %v5079_v3 }
 0x581   : > { %3905 = vmatprep.mubr.f32.mxu1 %v5843_v14  ;;  %v5882_v14 = vunpack.c.h.bf16 %v5052_v19  ;;  %v2463_v19 = vld [vmem:[#allocation3 + $0x80] sm:$0xff] }
 0x584   : > { %3906 = vmatmul.mubr.f32.gmra.mrb[50].mxu1 %v5844_v16  ;;  %v5884_v16 = vunpack.c.h.bf16 %v5061_v17  ;;  %v2467_v17 = vld [vmem:[#allocation3 + $0xa0] sm:$0xff] }
 0x585   : > { %3908 = vmatprep.mubr.f32.mxu1 %v5845_v59  ;;  %v5886_v59 = vunpack.c.h.bf16 %v5070_v60  ;;  %v2469_v60 = vld [vmem:[#allocation3 + $0xb0] sm:$0xff] }
 0x588   : > { %3909 = vmatmul.mubr.f32.gmra.mrb[52].mxu1 %v5846_v9  ;;  %v5888_v9 = vunpack.c.h.bf16 %v5079_v3  ;;  %v2472_v3 = vld [vmem:[#allocation3 + $0xc8] sm:$0xff] }
 0x589   : > { %3911 = vmatprep.mubr.f32.mxu1 %v5847_v50  ;;  %v2464_v50 = vld [vmem:[#allocation3 + $0x88] sm:$0xff] }
 0x58c   : > { %3912 = vmatmul.mubr.f32.gmra.mrb[54].mxu1 %v5848_v45  ;;  %v4257_v45 = vpack.c.bf16 %v2464_v50, %v2463_v19  ;;  %v2477_v50 = vld [vmem:[#allocation3 + $0xf0] sm:$0xff] }
 0x58d   : > { %3914 = vmatprep.mubr.f32.mxu1 %v5849_v8  ;;  %v2465_v8 = vld [vmem:[#allocation3 + $0x90] sm:$0xff] }
 0x58e   : > { %4258 = vmatprep.subr.bf16.mxu0 %v4257_v45 }
 0x58f   : > { %4260 = vmatpush3.bf16.msra.mxu0 %v4257_v45  ;;  %v2478_v45 = vld [vmem:[#allocation3 + $0xf8] sm:$0xff] }
 0x590   : > { %3915 = vmatmul.mubr.f32.gmra.mrb[56].mxu1 %v5850_v36  ;;  %v2466_v36 = vld [vmem:[#allocation3 + $0x98] sm:$0xff] }
 0x591   : > { %3917 = vmatprep.mubr.f32.mxu1 %v5851_v4  ;;  %v4261_v4 = vpack.c.bf16 %v2466_v36, %v2465_v8  ;;  %v4285_v8 = vpack.c.bf16 %v2478_v45, %v2477_v50 }
 0x593   : > { %4262 = vmatprep.subr.bf16.mxu0 %v4261_v4 }
 0x594   : > { %3918 = vmatmul.mubr.f32.gmra.mrb[58].mxu1 %v5852_v23  ;;  %v2468_v23 = vld [vmem:[#allocation3 + $0xa8] sm:$0xff]  ;;  %4264 = vmatpush3.bf16.msra.mxu0 %v4261_v4 }
 0x595   : > { %3920 = vmatprep.mubr.f32.mxu1 %v5853_v7  ;;  %v4265_v7 = vpack.c.bf16 %v2468_v23, %v2467_v17 }
 0x597   : > { %4266 = vmatprep.subr.bf16.mxu0 %v4265_v7 }
 0x598   : > { %3921 = vmatmul.mubr.f32.gmra.mrb[60].mxu1 %v5854_v10  ;;  %v2470_v10 = vld [vmem:[#allocation3 + $0xb8] sm:$0xff]  ;;  %4268 = vmatpush3.bf16.msra.mxu0 %v4265_v7 }
 0x599   : > { %3923 = vmatprep.mubr.f32.mxu1 %v5855_v13  ;;  %v4269_v13 = vpack.c.bf16 %v2470_v10, %v2469_v60 }
 0x59b   : > { %4270 = vmatprep.subr.bf16.mxu0 %v4269_v13 }
 0x59c   : > { %3924 = vmatmul.mubr.f32.gmra.mrb[62].mxu1 %v5856_v22  ;;  %v2471_v22 = vld [vmem:[#allocation3 + $0xc0] sm:$0xff]  ;;  %4272 = vmatpush3.bf16.msra.mxu0 %v4269_v13 }
 0x59d   : > { %3926 = vmatprep.mubr.f32.mxu1 %v5857_v21  ;;  %v4273_v21 = vpack.c.bf16 %v2472_v3, %v2471_v22 }
 0x59f   : > { %4274 = vmatprep.subr.bf16.mxu0 %v4273_v21 }
 0x5a0   : > { %3927 = vmatmul.mubr.f32.gmra.mrb[64].mxu1 %v5858_v62  ;;  %4276 = vmatpush3.bf16.msra.mxu0 %v4273_v21 }
 0x5a1   : > { %3929 = vmatprep.mubr.f32.mxu1 %v5859_v28 }
 0x5a4   : > { %3930 = vmatmul.mubr.f32.gmra.mrb[66].mxu1 %v5860_v37 }
 0x5a5   : > { %3932 = vmatprep.mubr.f32.mxu1 %v5861_v35 }
 0x5a8   : > { %3933 = vmatmul.mubr.f32.gmra.mrb[68].mxu1 %v5862_v2 }
 0x5a9   : > { %3935 = vmatprep.mubr.f32.mxu1 %v5863_v42 }
 0x5ac   : > { %3936 = vmatmul.mubr.f32.gmra.mrb[70].mxu1 %v5864_v57 }
 0x5ad   : > { %3938 = vmatprep.mubr.f32.mxu1 %v5865_v49 }
 0x5b0   : > { %3939 = vmatmul.mubr.f32.gmra.mrb[72].mxu1 %v5866_v31 }
 0x5b1   : > { %3941 = vmatprep.mubr.f32.mxu1 %v5867_v56 }
 0x5b4   : > { %3942 = vmatmul.mubr.f32.gmra.mrb[74].mxu1 %v5868_v43 }
 0x5b5   : > { %3944 = vmatprep.mubr.f32.mxu1 %v5869_v63 }
 0x5b8   : > { %3945 = vmatmul.mubr.f32.gmra.mrb[76].mxu1 %v5870_v58 }
 0x5b9   : > { %3947 = vmatprep.mubr.f32.mxu1 %v5871_v53 }
 0x5bc   : > { %3948 = vmatmul.mubr.f32.gmra.mrb[78].mxu1 %v5872_v15  ;;  %v2473_v15 = vld [vmem:[#allocation3 + $0xd0] sm:$0xff] }
 0x5bd   : > { %3950 = vmatprep.mubr.f32.mxu1 %v5873_v48  ;;  %v2474_v48 = vld [vmem:[#allocation3 + $0xd8] sm:$0xff] }
 0x5c0   : > { %3951 = vmatmul.mubr.f32.gmra.mrb[80].mxu1 %v5874_v29  ;;  %v4277_v29 = vpack.c.bf16 %v2474_v48, %v2473_v15 }
 0x5c1   : > { %3953 = vmatprep.mubr.f32.mxu1 %v5875_v46 }
 0x5c2   : > { %4278 = vmatprep.subr.bf16.mxu0 %v4277_v29 }
 0x5c3   : > { %4280 = vmatpush3.bf16.msra.mxu0 %v4277_v29 }
 0x5c4   : > { %3954 = vmatmul.mubr.f32.gmra.mrb[82].mxu1 %v5876_v6 }
 0x5c5   : > { %3956 = vmatprep.mubr.f32.mxu1 %v5877_v41 }
 0x5c8   : > { %3957 = vmatmul.mubr.f32.gmra.mrb[84].mxu1 %v5878_v0 }
 0x5c9   : > { %3959 = vmatprep.mubr.f32.mxu1 %v5879_v39 }
 0x5cc   : > { %3960 = vmatmul.mubr.f32.gmra.mrb[86].mxu1 %v5880_v55 }
 0x5cd   : > { %3962 = vmatprep.mubr.f32.mxu1 %v5881_v34  ;;  %v2475_v34 = vld [vmem:[#allocation3 + $0xe0] sm:$0xff] }
 0x5d0   : > { %3963 = vmatmul.mubr.f32.gmra.mrb[88].mxu1 %v5882_v14  ;;  %v2476_v14 = vld [vmem:[#allocation3 + $0xe8] sm:$0xff] }
 0x5d1   : > { %3965 = vmatprep.mubr.f32.mxu1 %v5883_v32  ;;  %v4281_v32 = vpack.c.bf16 %v2476_v14, %v2475_v34 }
 0x5d3   : > { %4282 = vmatprep.subr.bf16.mxu0 %v4281_v32 }
 0x5d4   : > { %3966 = vmatmul.mubr.f32.gmra.mrb[90].mxu1 %v5884_v16  ;;  %4284 = vmatpush3.bf16.msra.mxu0 %v4281_v32 }
 0x5d5   : > { %3968 = vmatprep.mubr.f32.mxu1 %v5885_v27  ;;  %4286 = vmatprep.subr.bf16.mxu0 %v4285_v8 }
 0x5d8   : > { %3969 = vmatmul.mubr.f32.gmra.mrb[92].mxu1 %v5886_v59  ;;  %4288 = vmatpush3.bf16.msra.mxu0 %v4285_v8  ;;  %v3147_v8 = vld [vmem:[%s5748_s10 + $0x90] sm:$0xff] }
 0x5d9   : > { %3971 = vmatprep.mubr.f32.mxu1 %v5887_v25 }
 0x5dc   : > { %3972 = vmatmul.mubr.f32.gmra.mrb[94].mxu1 %v5888_v9 }
 0x653   : > { %v3904_v62 = vpop.f32.mrb[48].mxu1 }
 0x654   : > { %2271 = vst.msk [vmem:[#allocation2 + $0x8] sm:$0xff] %vm735_vm1, %v3904_v62  ;;  %v2031_v28 = vpop.f32.mrb[49].mxu1 }
 0x655   : > { %2270 = vst.msk [vmem:[#allocation2] sm:$0xff] %vm735_vm1, %v2031_v28 }
 0x657   : > { %v3907_v37 = vpop.f32.mrb[50].mxu1 }
 0x658   : > { %2273 = vst.msk [vmem:[#allocation2 + $0x18] sm:$0xff] %vm735_vm1, %v3907_v37  ;;  %v2041_v35 = vpop.f32.mrb[51].mxu1 }
 0x659   : > { %2272 = vst.msk [vmem:[#allocation2 + $0x10] sm:$0xff] %vm735_vm1, %v2041_v35 }
 0x65b   : > { %v3910_v2 = vpop.f32.mrb[52].mxu1 }
 0x65c   : > { %2275 = vst.msk [vmem:[#allocation2 + $0x28] sm:$0xff] %vm735_vm1, %v3910_v2  ;;  %v2051_v42 = vpop.f32.mrb[53].mxu1 }
 0x65d   : > { %2274 = vst.msk [vmem:[#allocation2 + $0x20] sm:$0xff] %vm735_vm1, %v2051_v42 }
 0x65f   : > { %v3913_v57 = vpop.f32.mrb[54].mxu1 }
 0x660   : > { %2277 = vst.msk [vmem:[#allocation2 + $0x38] sm:$0xff] %vm735_vm1, %v3913_v57  ;;  %v2061_v49 = vpop.f32.mrb[55].mxu1 }
 0x661   : > { %2276 = vst.msk [vmem:[#allocation2 + $0x30] sm:$0xff] %vm735_vm1, %v2061_v49 }
 0x663   : > { %v3916_v31 = vpop.f32.mrb[56].mxu1 }
 0x664   : > { %2279 = vst.msk [vmem:[#allocation2 + $0x48] sm:$0xff] %vm735_vm1, %v3916_v31  ;;  %v2071_v56 = vpop.f32.mrb[57].mxu1 }
 0x665   : > { %2278 = vst.msk [vmem:[#allocation2 + $0x40] sm:$0xff] %vm735_vm1, %v2071_v56  ;;  %v3145_v56 = vld [vmem:[%s5748_s10 + $0x80] sm:$0xff] }
 0x667   : > { %v3919_v43 = vpop.f32.mrb[58].mxu1 }
 0x668   : > { %2281 = vst.msk [vmem:[#allocation2 + $0x58] sm:$0xff] %vm735_vm1, %v3919_v43  ;;  %v2081_v63 = vpop.f32.mrb[59].mxu1  ;;  %v3146_v43 = vld [vmem:[%s5748_s10 + $0x88] sm:$0xff] }
 0x669   : > { %2280 = vst.msk [vmem:[#allocation2 + $0x50] sm:$0xff] %vm735_vm1, %v2081_v63  ;;  %v4289_v63 = vpack.c.bf16 %v3146_v43, %v3145_v56  ;;  %v3153_v56 = vld [vmem:[%s5748_s10 + $0xc0] sm:$0xff]  ;;  %v3154_v43 = vld [vmem:[%s5748_s10 + $0xc8] sm:$0xff] }
 0x66b   : > { %v3922_v58 = vpop.f32.mrb[60].mxu1  ;;  %4290 = vmatprep.subr.bf16.mxu0 %v4289_v63 }
 0x66c   : > { %2283 = vst.msk [vmem:[#allocation2 + $0x68] sm:$0xff] %vm735_vm1, %v3922_v58  ;;  %v2091_v53 = vpop.f32.mrb[61].mxu1 }
 0x66d   : > { %2282 = vst.msk [vmem:[#allocation2 + $0x60] sm:$0xff] %vm735_vm1, %v2091_v53 }
 0x66f   : > { %v3925_v46 = vpop.f32.mrb[62].mxu1 }
 0x670   : > { %2285 = vst.msk [vmem:[#allocation2 + $0x78] sm:$0xff] %vm735_vm1, %v3925_v46  ;;  %v2101_v6 = vpop.f32.mrb[63].mxu1 }
 0x671   : > { %2284 = vst.msk [vmem:[#allocation2 + $0x70] sm:$0xff] %vm735_vm1, %v2101_v6 }
 0x673   : > { %v3928_v41 = vpop.f32.mrb[64].mxu1 }
 0x674   : > { %2304 = vrot.lane.b32.xlu1 %v3928_v41, %s4503_s17  ;;  %v2111_v0 = vpop.f32.mrb[65].mxu1 }
 0x675   : > { %2302 = vrot.lane.b32.xlu0 %v2111_v0, %s4503_s17 }
 0x677   : > { %v3931_v39 = vpop.f32.mrb[66].mxu1 }
 0x678   : > { %2308 = vrot.lane.b32.xlu1 %v3931_v39, %s4503_s17  ;;  %v2121_v55 = vpop.f32.mrb[67].mxu1 }
 0x679   : > { %2306 = vrot.lane.b32.xlu0 %v2121_v55, %s4503_s17 }
 0x67b   : > { %v3934_v16 = vpop.f32.mrb[68].mxu1 }
 0x67c   : > { %2312 = vrot.lane.b32.xlu1 %v3934_v16, %s4503_s17  ;;  %v2131_v27 = vpop.f32.mrb[69].mxu1 }
 0x67d   : > { %2310 = vrot.lane.b32.xlu0 %v2131_v27, %s4503_s17 }
 0x67f   : > { %v3937_v59 = vpop.f32.mrb[70].mxu1 }
 0x680   : > { %2316 = vrot.lane.b32.xlu1 %v3937_v59, %s4503_s17  ;;  %v2141_v25 = vpop.f32.mrb[71].mxu1 }
 0x681   : > { %2314 = vrot.lane.b32.xlu0 %v2141_v25, %s4503_s17 }
 0x683   : > { %v3940_v9 = vpop.f32.mrb[72].mxu1 }
 0x684   : > { %2320 = vrot.lane.b32.xlu1 %v3940_v9, %s4503_s17  ;;  %v2151_v19 = vpop.f32.mrb[73].mxu1 }
 0x685   : > { %2318 = vrot.lane.b32.xlu0 %v2151_v19, %s4503_s17 }
 0x687   : > { %v3943_v36 = vpop.f32.mrb[74].mxu1 }
 0x688   : > { %2324 = vrot.lane.b32.xlu1 %v3943_v36, %s4503_s17  ;;  %v2161_v4 = vpop.f32.mrb[75].mxu1  ;;  %v3148_v36 = vld [vmem:[%s5748_s10 + $0x98] sm:$0xff] }
 0x689   : > { %2322 = vrot.lane.b32.xlu0 %v2161_v4, %s4503_s17 }
 0x68b   : > { %v3946_v17 = vpop.f32.mrb[76].mxu1 }
 0x68c   : > { %2328 = vrot.lane.b32.xlu1 %v3946_v17, %s4503_s17  ;;  %v2171_v23 = vpop.f32.mrb[77].mxu1 }
 0x68d   : > { %2326 = vrot.lane.b32.xlu0 %v2171_v23, %s4503_s17 }
 0x68f   : > { %v3949_v7 = vpop.f32.mrb[78].mxu1 }
 0x690   : > { %2332 = vrot.lane.b32.xlu1 %v3949_v7, %s4503_s17  ;;  %v2181_v60 = vpop.f32.mrb[79].mxu1  ;;  %v4293_v7 = vpack.c.bf16 %v3148_v36, %v3147_v8  ;;  %v3159_v8 = vld [vmem:[%s5748_s10 + $0xf0] sm:$0xff]  ;;  %v3160_v36 = vld [vmem:[%s5748_s10 + $0xf8] sm:$0xff] }
 0x691   : > { %2330 = vrot.lane.b32.xlu0 %v2181_v60, %s4503_s17  ;;  %s2986_s17 = sshll.u32 %s472_s16, 4  ;;  %s5697_s17 = int_to_ptr.vmem [resolvable:$true] %s2986_s17 }
 0x692   : > { %s4431_s27 = scalar_lea.vmem %s5697_s17, 128 }
 0x693   : > { %v3952_v10 = vpop.f32.mrb[80].mxu1  ;;  %p4432_p9 = scmp.ne.s32.totalorder %s5697_s17, %s4431_s27 }
 0x694   : > { %2384 = vrot.lane.b32.xlu1 %v3952_v10, %s4504_s24  ;;  %v2191_v13 = vpop.f32.mrb[81].mxu1  ;;  %v3149_v10 = vld [vmem:[%s5748_s10 + $0xa0] sm:$0xff] }
 0x695   : > { %2382 = vrot.lane.b32.xlu0 %v2191_v13, %s4504_s24  ;;  %v3150_v13 = vld [vmem:[%s5748_s10 + $0xa8] sm:$0xff]  ;;  %p4433_p12 = pnand %p4432_p9, %p5890_p10 }
 0x697   : > { %v3955_v22 = vpop.f32.mrb[82].mxu1  ;;  %p4434_p2 = pneg %p4433_p12 }
 0x698   : > { %2388 = vrot.lane.b32.xlu1 %v3955_v22, %s4504_s24  ;;  %v2201_v3 = vpop.f32.mrb[83].mxu1 }
 0x699   : > { %2386 = vrot.lane.b32.xlu0 %v2201_v3, %s4504_s24 }
 0x69b   : > { %v3958_v21 = vpop.f32.mrb[84].mxu1 }
 0x69c   : > { %2392 = vrot.lane.b32.xlu1 %v3958_v21, %s4504_s24  ;;  %v2211_v62 = vpop.f32.mrb[85].mxu1 }
 0x69d   : > { %2390 = vrot.lane.b32.xlu0 %v2211_v62, %s4504_s24  ;;  %v4297_v62 = vpack.c.bf16 %v3150_v13, %v3149_v10 }
 0x69f   : > { %v3961_v28 = vpop.f32.mrb[86].mxu1 }
 0x6a0   : > { %2396 = vrot.lane.b32.xlu1 %v3961_v28, %s4504_s24  ;;  %v2221_v37 = vpop.f32.mrb[87].mxu1 }
 0x6a1   : > { %2394 = vrot.lane.b32.xlu0 %v2221_v37, %s4504_s24  ;;  %v3151_v37 = vld [vmem:[%s5748_s10 + $0xb0] sm:$0xff] }
 0x6a3   : > { %v3964_v35 = vpop.f32.mrb[88].mxu1 }
 0x6a4   : > { %2400 = vrot.lane.b32.xlu1 %v3964_v35, %s4504_s24  ;;  %v2231_v2 = vpop.f32.mrb[89].mxu1  ;;  %v3152_v35 = vld [vmem:[%s5748_s10 + $0xb8] sm:$0xff] }
 0x6a5   : > { %2398 = vrot.lane.b32.xlu0 %v2231_v2, %s4504_s24 }
 0x6a7   : > { %v3967_v42 = vpop.f32.mrb[90].mxu1 }
 0x6a8   : > { %2404 = vrot.lane.b32.xlu1 %v3967_v42, %s4504_s24  ;;  %v2241_v57 = vpop.f32.mrb[91].mxu1 }
 0x6a9   : > { %2402 = vrot.lane.b32.xlu0 %v2241_v57, %s4504_s24 }
 0x6ab   : > { %v3970_v49 = vpop.f32.mrb[92].mxu1 }
 0x6ac   : > { %2408 = vrot.lane.b32.xlu1 %v3970_v49, %s4504_s24  ;;  %v2251_v31 = vpop.f32.mrb[93].mxu1  ;;  %v4301_v49 = vpack.c.bf16 %v3152_v35, %v3151_v37 }
 0x6ad   : > { %2406 = vrot.lane.b32.xlu0 %v2251_v31, %s4504_s24 }
 0x6af   : > { %v3973_v58 = vpop.f32.mrb[94].mxu1 }
 0x6b0   : > { %2412 = vrot.lane.b32.xlu1 %v3973_v58, %s4504_s24  ;;  %v2261_v53 = vpop.f32.mrb[95].mxu1 }
 0x6b1   : > { %2410 = vrot.lane.b32.xlu0 %v2261_v53, %s4504_s24  ;;  %s5602_s24 = scalar_lea.vmem %s5750_s12, %s3102_s14  ;;  %s4435_s14 = sshll.u32 %s4507_s29, 4  ;;  %s4436_s14 = int_to_ptr.vmem [resolvable:$false] %s4435_s14 }
 0x6b2   : > { %s4437_s20 = scalar_lea.vmem %s4436_s14, 256  ;;  %p4438_p3 = scmp.lt.s32.totalorder %s5697_s17, %s4436_s14 }
 0x6b3   : > { %p4439_p4 = scmp.lt.s32.totalorder %s4437_s20, %s4431_s27 }
 0x6b5   : > { %p4440_p7 = por %p4439_p4, %p4438_p3 }
 0x6b7   : > { %p4441_p8 = pnand %p4440_p7, %p4434_p2 }
 0x6e6   : > { %v2305_v15 = vpop.permute.xlu1 %2304 }
 0x6e7   : > { %2351 = vst.msk [vmem:[#allocation2 + $0x8] sm:$0xff] %vm1443_vm3, %v2305_v15  ;;  %v2303_v48 = vpop.permute.xlu0 %2302  ;;  %v4305_v15 = vpack.c.bf16 %v3154_v43, %v3153_v56 }
 0x6e8   : > { %2350 = vst.msk [vmem:[#allocation2] sm:$0xff] %vm1443_vm3, %v2303_v48 }
 0x6ea   : > { %v2309_v29 = vpop.permute.xlu1 %2308 }
 0x6eb   : > { %2353 = vst.msk [vmem:[#allocation2 + $0x18] sm:$0xff] %vm1443_vm3, %v2309_v29  ;;  %v2307_v46 = vpop.permute.xlu0 %2306  ;;  %v3155_v29 = vld [vmem:[%s5748_s10 + $0xd0] sm:$0xff] }
 0x6ec   : > { %2352 = vst.msk [vmem:[#allocation2 + $0x10] sm:$0xff] %vm1443_vm3, %v2307_v46  ;;  %v3156_v46 = vld [vmem:[%s5748_s10 + $0xd8] sm:$0xff] }
 0x6ee   : > { %v2313_v6 = vpop.permute.xlu1 %2312 }
 0x6ef   : > { %2355 = vst.msk [vmem:[#allocation2 + $0x28] sm:$0xff] %vm1443_vm3, %v2313_v6  ;;  %v2311_v41 = vpop.permute.xlu0 %2310 }
 0x6f0   : > { %2354 = vst.msk [vmem:[#allocation2 + $0x20] sm:$0xff] %vm1443_vm3, %v2311_v41 }
 0x6f2   : > { %v2317_v0 = vpop.permute.xlu1 %2316 }
 0x6f3   : > { %2357 = vst.msk [vmem:[#allocation2 + $0x38] sm:$0xff] %vm1443_vm3, %v2317_v0  ;;  %v2315_v39 = vpop.permute.xlu0 %2314 }
 0x6f4   : > { %2356 = vst.msk [vmem:[#allocation2 + $0x30] sm:$0xff] %vm1443_vm3, %v2315_v39  ;;  %v4309_v39 = vpack.c.bf16 %v3156_v46, %v3155_v29 }
 0x6f6   : > { %v2321_v55 = vpop.permute.xlu1 %2320 }
 0x6f7   : > { %2359 = vst.msk [vmem:[#allocation2 + $0x48] sm:$0xff] %vm1443_vm3, %v2321_v55  ;;  %v2319_v34 = vpop.permute.xlu0 %2318 }
 0x6f8   : > { %2358 = vst.msk [vmem:[#allocation2 + $0x40] sm:$0xff] %vm1443_vm3, %v2319_v34  ;;  %v3157_v34 = vld [vmem:[%s5748_s10 + $0xe0] sm:$0xff] }
 0x6fa   : > { %v2325_v14 = vpop.permute.xlu1 %2324 }
 0x6fb   : > { %2361 = vst.msk [vmem:[#allocation2 + $0x58] sm:$0xff] %vm1443_vm3, %v2325_v14  ;;  %v2323_v32 = vpop.permute.xlu0 %2322  ;;  %v3158_v14 = vld [vmem:[%s5748_s10 + $0xe8] sm:$0xff] }
 0x6fc   : > { %2360 = vst.msk [vmem:[#allocation2 + $0x50] sm:$0xff] %vm1443_vm3, %v2323_v32 }
 0x6fe   : > { %v2329_v16 = vpop.permute.xlu1 %2328 }
 0x6ff   : > { %2363 = vst.msk [vmem:[#allocation2 + $0x68] sm:$0xff] %vm1443_vm3, %v2329_v16  ;;  %v2327_v27 = vpop.permute.xlu0 %2326 }
 0x700   : > { %2362 = vst.msk [vmem:[#allocation2 + $0x60] sm:$0xff] %vm1443_vm3, %v2327_v27 }
 0x702   : > { %v2333_v59 = vpop.permute.xlu1 %2332 }
 0x703   : > { %2365 = vst.msk [vmem:[#allocation2 + $0x78] sm:$0xff] %vm1443_vm3, %v2333_v59  ;;  %v2331_v25 = vpop.permute.xlu0 %2330  ;;  %v4313_v59 = vpack.c.bf16 %v3158_v14, %v3157_v34 }
 0x704   : > { %2364 = vst.msk [vmem:[#allocation2 + $0x70] sm:$0xff] %vm1443_vm3, %v2331_v25 }
 0x706   : > { %v2385_v9 = vpop.permute.xlu1 %2384 }
 0x707   : > { %2431 = vst.msk [vmem:[#allocation2 + $0x8] sm:$0xff] %vm1524_vm4, %v2385_v9  ;;  %v2383_v19 = vpop.permute.xlu0 %2382 }
 0x708   : > { %2430 = vst.msk [vmem:[#allocation2] sm:$0xff] %vm1524_vm4, %v2383_v19 }
 0x70a   : > { %v2389_v50 = vpop.permute.xlu1 %2388 }
 0x70b   : > { %2433 = vst.msk [vmem:[#allocation2 + $0x18] sm:$0xff] %vm1524_vm4, %v2389_v50  ;;  %v2387_v45 = vpop.permute.xlu0 %2386 }
 0x70c   : > { %2432 = vst.msk [vmem:[#allocation2 + $0x10] sm:$0xff] %vm1524_vm4, %v2387_v45 }
 0x70e   : > { %v2393_v4 = vpop.permute.xlu1 %2392  ;;  %v2447_v60 = vld [vmem:[#allocation2 + $0x8] sm:$0xff] }
 0x70f   : > { %2435 = vst.msk [vmem:[#allocation2 + $0x28] sm:$0xff] %vm1524_vm4, %v2393_v4  ;;  %v2391_v17 = vpop.permute.xlu0 %2390  ;;  %v2446_v23 = vld [vmem:[#allocation2] sm:$0xff]  ;;  %v4317_v4 = vpack.c.bf16 %v3160_v36, %v3159_v8 }
 0x710   : > { %2434 = vst.msk [vmem:[#allocation2 + $0x20] sm:$0xff] %vm1524_vm4, %v2391_v17  ;;  %4006 = vmatprep.mubr.f32.mxu0 %v2446_v23  ;;  %v3143_v17 = vld [vmem:[%s5747_s9 + $0x1] ss:$0 sm:$0xff] }
 0x711   : > { %4007 = vmatmul.mubr.f32.vlgmr.msra.gmra.mrb[64].mxu0 %v2447_v60 }
 0x712   : > { %v2397_v22 = vpop.permute.xlu1 %2396  ;;  %4292 = vmatpush3.bf16.msra.mxu0 %v4289_v63  ;;  %v2449_v28 = vld [vmem:[#allocation2 + $0x18] sm:$0xff] }
 0x713   : > { %2437 = vst.msk [vmem:[#allocation2 + $0x38] sm:$0xff] %vm1524_vm4, %v2397_v22  ;;  %v2395_v3 = vpop.permute.xlu0 %2394  ;;  %v2448_v21 = vld [vmem:[#allocation2 + $0x10] sm:$0xff]  ;;  %4294 = vmatprep.subr.bf16.mxu0 %v4293_v7 }
 0x714   : > { %2436 = vst.msk [vmem:[#allocation2 + $0x30] sm:$0xff] %vm1524_vm4, %v2395_v3  ;;  %4009 = vmatprep.mubr.f32.mxu0 %v2448_v21 }
 0x715   : > { %4010 = vmatmul.mubr.f32.gmra.mrb[66].mxu0 %v2449_v28 }
 0x716   : > { %v2401_v2 = vpop.permute.xlu1 %2400  ;;  %4296 = vmatpush3.bf16.msra.mxu0 %v4293_v7  ;;  %v2451_v31 = vld [vmem:[#allocation2 + $0x28] sm:$0xff] }
 0x717   : > { %2439 = vst.msk [vmem:[#allocation2 + $0x48] sm:$0xff] %vm1524_vm4, %v2401_v2  ;;  %v2399_v42 = vpop.permute.xlu0 %2398  ;;  %v2450_v57 = vld [vmem:[#allocation2 + $0x20] sm:$0xff]  ;;  %4298 = vmatprep.subr.bf16.mxu0 %v4297_v62 }
 0x718   : > { %2438 = vst.msk [vmem:[#allocation2 + $0x40] sm:$0xff] %vm1524_vm4, %v2399_v42  ;;  %4012 = vmatprep.mubr.f32.mxu0 %v2450_v57 }
 0x719   : > { %4013 = vmatmul.mubr.f32.gmra.mrb[68].mxu0 %v2451_v31 }
 0x71a   : > { %v2405_v63 = vpop.permute.xlu1 %2404  ;;  %4300 = vmatpush3.bf16.msra.mxu0 %v4297_v62  ;;  %v2453_v48 = vld [vmem:[#allocation2 + $0x38] sm:$0xff] }
 0x71b   : > { %2441 = vst.msk [vmem:[#allocation2 + $0x58] sm:$0xff] %vm1524_vm4, %v2405_v63  ;;  %v2403_v58 = vpop.permute.xlu0 %2402  ;;  %v2452_v53 = vld [vmem:[#allocation2 + $0x30] sm:$0xff]  ;;  %4302 = vmatprep.subr.bf16.mxu0 %v4301_v49 }
 0x71c   : > { %2440 = vst.msk [vmem:[#allocation2 + $0x50] sm:$0xff] %vm1524_vm4, %v2403_v58  ;;  %4015 = vmatprep.mubr.f32.mxu0 %v2452_v53 }
 0x71d   : > { %4016 = vmatmul.mubr.f32.gmra.mrb[70].mxu0 %v2453_v48 }
 0x71e   : > { %v2409_v6 = vpop.permute.xlu1 %2408  ;;  %4304 = vmatpush3.bf16.msra.mxu0 %v4301_v49  ;;  %v2455_v55 = vld [vmem:[#allocation2 + $0x48] sm:$0xff] }
 0x71f   : > { %2443 = vst.msk [vmem:[#allocation2 + $0x68] sm:$0xff] %vm1524_vm4, %v2409_v6  ;;  %v2407_v41 = vpop.permute.xlu0 %2406  ;;  %v2454_v0 = vld [vmem:[#allocation2 + $0x40] sm:$0xff]  ;;  %4306 = vmatprep.subr.bf16.mxu0 %v4305_v15 }
 0x720   : > { %2442 = vst.msk [vmem:[#allocation2 + $0x60] sm:$0xff] %vm1524_vm4, %v2407_v41  ;;  %4018 = vmatprep.mubr.f32.mxu0 %v2454_v0 }
 0x721   : > { %4019 = vmatmul.mubr.f32.gmra.mrb[72].mxu0 %v2455_v55 }
 0x722   : > { %v2413_v32 = vpop.permute.xlu1 %2412  ;;  %4308 = vmatpush3.bf16.msra.mxu0 %v4305_v15  ;;  %v2457_v25 = vld [vmem:[#allocation2 + $0x58] sm:$0xff] }
 0x723   : > { %2445 = vst.msk [vmem:[#allocation2 + $0x78] sm:$0xff] %vm1524_vm4, %v2413_v32  ;;  %v2411_v16 = vpop.permute.xlu0 %2410  ;;  %v2456_v27 = vld [vmem:[#allocation2 + $0x50] sm:$0xff]  ;;  %4310 = vmatprep.subr.bf16.mxu0 %v4309_v39 }
 0x724   : > { %2444 = vst.msk [vmem:[#allocation2 + $0x70] sm:$0xff] %vm1524_vm4, %v2411_v16  ;;  %4021 = vmatprep.mubr.f32.mxu0 %v2456_v27 }
 0x725   : > { %4022 = vmatmul.mubr.f32.gmra.mrb[74].mxu0 %v2457_v25 }
 0x726   : > { %4312 = vmatpush3.bf16.msra.mxu0 %v4309_v39  ;;  %v2459_v19 = vld [vmem:[#allocation2 + $0x68] sm:$0xff] }
 0x727   : > { %v2458_v9 = vld [vmem:[#allocation2 + $0x60] sm:$0xff]  ;;  %4314 = vmatprep.subr.bf16.mxu0 %v4313_v59 }
 0x728   : > { %4024 = vmatprep.mubr.f32.mxu0 %v2458_v9 }
 0x729   : > { %4025 = vmatmul.mubr.f32.gmra.mrb[76].mxu0 %v2459_v19 }
 0x72a   : > { %4316 = vmatpush3.bf16.msra.mxu0 %v4313_v59  ;;  %v2461_v45 = vld [vmem:[#allocation2 + $0x78] sm:$0xff] }
 0x72b   : > { %v2460_v50 = vld [vmem:[#allocation2 + $0x70] sm:$0xff]  ;;  %4318 = vmatprep.subr.bf16.mxu0 %v4317_v4 }
 0x72c   : > { %4027 = vmatprep.mubr.f32.mxu0 %v2460_v50 }
 0x72d   : > { %4028 = vmatmul.mubr.f32.gmra.mrb[78].mxu0 %v2461_v45 }
 0x72e   : > { %4320 = vmatpush3.bf16.msra.mxu0 %v4317_v4 }
 0x7e4   : > { %v4008_v23 = vpop.f32.mrb[64].mxu0 }
 0x7e5   : > { %v2559_v7 = vadd.f32 %v4008_v23, %v3143_v17  ;;  %v2553_v60 = vpop.f32.mrb[65].mxu0 }
 0x7e6   : > { %v2554_v10 = vadd.f32 %v3143_v17, %v2553_v60 }
 0x7e7   : > { %v2633_v3 = vmax.f32 %v2559_v7, 0.0 }
 0x7e8   : > { %v2632_v13 = vmax.f32 %v2554_v10, 0.0  ;;  %v4011_v22 = vpop.f32.mrb[66].mxu0  ;;  %v4505_v10 = vmov 0.0|0.0  }
 0x7e9   : > { %v2569_v21 = vadd.f32 %v4011_v22, %v3143_v17  ;;  %v2563_v62 = vpop.f32.mrb[67].mxu0  ;;  %4321 = vmatprep.subr.bf16.mxu0 %v4505_v10  ;;  %v3144_v22 = vld [vmem:[%s5745_s7 + $0x1] sm:$0x1] }
 0x7ea   : > { %v2564_v28 = vadd.f32 %v3143_v17, %v2563_v62  ;;  %4062 = vmatprep.mubr.f32.mxu0 %v2632_v13  ;;  %v5889_v13 = vmov 0.0  }
 0x7eb   : > { %4063 = vmatmul.mubr.f32.vlgmr.msra.gmra.mrb[80].mxu0 %v2633_v3  ;;  %v2635_v2 = vmax.f32 %v2569_v21, 0.0  ;;  %v2650_v3 = vadd.f32 1.0, %v3144_v22 }
 0x7ec   : > { %v2634_v37 = vmax.f32 %v2564_v28, 0.0  ;;  %v4014_v35 = vpop.f32.mrb[68].mxu0  ;;  %v5593_v28 = vld [vmem:[%s5749_s11 + $0x1] ss:$0 sm:$0xff] }
 0x7ed   : > { %v2579_v42 = vadd.f32 %v4014_v35, %v3143_v17  ;;  %v2573_v57 = vpop.f32.mrb[69].mxu0 }
 0x7ee   : > { %v2574_v49 = vadd.f32 %v3143_v17, %v2573_v57  ;;  %4065 = vmatprep.mubr.f32.mxu0 %v2634_v37 }
 0x7ef   : > { %4066 = vmatmul.mubr.f32.gmra.mrb[82].mxu0 %v2635_v2  ;;  %v2637_v43 = vmax.f32 %v2579_v42, 0.0 }
 0x7f0   : > { %v2636_v31 = vmax.f32 %v2574_v49, 0.0  ;;  %v4017_v56 = vpop.f32.mrb[70].mxu0 }
 0x7f1   : > { %v2589_v63 = vadd.f32 %v4017_v56, %v3143_v17  ;;  %v2583_v58 = vpop.f32.mrb[71].mxu0 }
 0x7f2   : > { %v2584_v53 = vadd.f32 %v3143_v17, %v2583_v58  ;;  %4068 = vmatprep.mubr.f32.mxu0 %v2636_v31 }
 0x7f3   : > { %4069 = vmatmul.mubr.f32.gmra.mrb[84].mxu0 %v2637_v43  ;;  %v2639_v29 = vmax.f32 %v2589_v63, 0.0 }
 0x7f4   : > { %v2638_v15 = vmax.f32 %v2584_v53, 0.0  ;;  %v4020_v48 = vpop.f32.mrb[72].mxu0 }
 0x7f5   : > { %v2599_v46 = vadd.f32 %v4020_v48, %v3143_v17  ;;  %v2593_v6 = vpop.f32.mrb[73].mxu0 }
 0x7f6   : > { %v2594_v41 = vadd.f32 %v3143_v17, %v2593_v6  ;;  %4071 = vmatprep.mubr.f32.mxu0 %v2638_v15 }
 0x7f7   : > { %4072 = vmatmul.mubr.f32.gmra.mrb[86].mxu0 %v2639_v29  ;;  %v2641_v55 = vmax.f32 %v2599_v46, 0.0 }
 0x7f8   : > { %v2640_v0 = vmax.f32 %v2594_v41, 0.0  ;;  %v4023_v39 = vpop.f32.mrb[74].mxu0 }
 0x7f9   : > { %v2609_v34 = vadd.f32 %v4023_v39, %v3143_v17  ;;  %v2603_v14 = vpop.f32.mrb[75].mxu0 }
 0x7fa   : > { %v2604_v32 = vadd.f32 %v3143_v17, %v2603_v14  ;;  %4074 = vmatprep.mubr.f32.mxu0 %v2640_v0 }
 0x7fb   : > { %4075 = vmatmul.mubr.f32.gmra.mrb[88].mxu0 %v2641_v55  ;;  %v2643_v59 = vmax.f32 %v2609_v34, 0.0 }
 0x7fc   : > { %v2642_v16 = vmax.f32 %v2604_v32, 0.0  ;;  %v4026_v27 = vpop.f32.mrb[76].mxu0 }
 0x7fd   : > { %v2619_v25 = vadd.f32 %v4026_v27, %v3143_v17  ;;  %v2613_v9 = vpop.f32.mrb[77].mxu0 }
 0x7fe   : > { %v2614_v19 = vadd.f32 %v3143_v17, %v2613_v9  ;;  %4077 = vmatprep.mubr.f32.mxu0 %v2642_v16 }
 0x7ff   : > { %4078 = vmatmul.mubr.f32.gmra.mrb[90].mxu0 %v2643_v59  ;;  %v2645_v8 = vmax.f32 %v2619_v25, 0.0 }
 0x800   : > { %v2644_v50 = vmax.f32 %v2614_v19, 0.0  ;;  %v4029_v45 = vpop.f32.mrb[78].mxu0 }
 0x801   : > { %v2629_v36 = vadd.f32 %v4029_v45, %v3143_v17  ;;  %v2623_v4 = vpop.f32.mrb[79].mxu0 }
 0x802   : > { %v2624_v23 = vadd.f32 %v3143_v17, %v2623_v4  ;;  %4080 = vmatprep.mubr.f32.mxu0 %v2644_v50  ;;  %v5586_v17 = vrot.slane %v2650_v3, %v1746_v11 }
 0x803   : > { %4081 = vmatmul.mubr.f32.gmra.mrb[92].mxu0 %v2645_v8  ;;  %v2647_v60 = vmax.f32 %v2629_v36, 0.0 }
 0x804   : > { %v2646_v7 = vmax.f32 %v2624_v23, 0.0  ;;  %v2658_v21 = vmul.f32 %v5586_v17, %v5249_v51  ;;  %v2657_v37 = vmul.f32 %v5586_v17, %v5252_v12  ;;  %v2660_v51 = vmul.f32 %v5586_v17, %v5263_v1 }
 0x805   : > { %v2659_v57 = vmul.f32 %v5586_v17, %v5269_v38  ;;  %v2662_v1 = vmul.f32 %v5586_v17, %v5277_v30  ;;  %v2661_v38 = vmul.f32 %v5586_v17, %v5283_v20  ;;  %v2664_v6 = vmul.f32 %v5586_v17, %v5291_v33 }
 0x806   : > { %4083 = vmatprep.mubr.f32.mxu0 %v2646_v7  ;;  %v2663_v20 = vmul.f32 %v5586_v17, %v5297_v18  ;;  %v2666_v32 = vmul.f32 %v5586_v17, %v5305_v40  ;;  %v2665_v18 = vmul.f32 %v5586_v17, %v5311_v26  ;;  %v2668_v50 = vmul.f32 %v5586_v17, %v5319_v47 }
 0x807   : > { %4084 = vmatmul.mubr.f32.gmra.mrb[94].mxu0 %v2647_v60  ;;  %v2667_v26 = vmul.f32 %v5586_v17, %v5325_v24  ;;  %v2670_v60 = vmul.f32 %v5586_v17, %v5333_v54  ;;  %v2669_v24 = vmul.f32 %v5586_v17, %v5339_v5 }
 0x808   : > { %4118 = vmatprep.mubr.msk.f32.mxu0 %vm4506_vm5, %v5889_v13 }
 0x8be   : > { %v4064_v62 = vpop.f32.mrb[80].mxu0 }
 0x8bf   : > { %v2836_v35 = vadd.f32 %v4064_v62, %v2658_v21  ;;  %v2756_v2 = vpop.f32.mrb[81].mxu0 }
 0x8c0   : > { %v2835_v44 = vadd.f32 %v2756_v2, %v2657_v37 }
 0x8c1   : > { %v2860_v11 = vadd.f32 %v5593_v28, %v2836_v35  ;;  %v2672_v35 = vmul.f32 %v5586_v17, %v5347_v61 }
 0x8c2   : > { %v2859_v42 = vadd.f32 %v5593_v28, %v2835_v44  ;;  %v4067_v12 = vpop.f32.mrb[82].mxu0  ;;  %v2671_v44 = vmul.f32 %v5586_v17, %v5350_v52  ;;  %v2891_v17 = vld [vmem:[%s5740_s2] sm:$0xff] }
 0x8c3   : > { %2876 = vst.msk [vmem:[%s5602_s24 + $0x8] sm:$0xff] %vm735_vm1, %v2860_v11  ;;  %v2838_v49 = vadd.f32 %v4067_v12, %v2660_v51  ;;  %v2766_v31 = vpop.f32.mrb[83].mxu0 }
 0x8c4   : > { %2875 = vst.msk [vmem:[%s5602_s24] sm:$0xff] %vm735_vm1, %v2859_v42  ;;  %v4322_v56 = vpack.c.bf16 %v2860_v11, %v2859_v42  ;;  %v2837_v43 = vadd.f32 %v2766_v31, %v2659_v57 }
 0x8c5   : > { %v2862_v63 = vadd.f32 %v5593_v28, %v2838_v49 }
 0x8c6   : > { %v2861_v58 = vadd.f32 %v5593_v28, %v2837_v43  ;;  %v4070_v53 = vpop.f32.mrb[84].mxu0  ;;  %4323 = vmatpush3.bf16.msra.mxu0 %v4322_v56 }
 0x8c7   : > { %2878 = vst.msk [vmem:[%s5602_s24 + $0x18] sm:$0xff] %vm735_vm1, %v2862_v63  ;;  %v2840_v15 = vadd.f32 %v4070_v53, %v2662_v1  ;;  %v2776_v48 = vpop.f32.mrb[85].mxu0  ;;  %4324 = vmatprep.subr.bf16.mxu0 %v4505_v10 }
 0x8c8   : > { %2877 = vst.msk [vmem:[%s5602_s24 + $0x10] sm:$0xff] %vm735_vm1, %v2861_v58  ;;  %v4325_v29 = vpack.c.bf16 %v2862_v63, %v2861_v58  ;;  %v2839_v46 = vadd.f32 %v2776_v48, %v2661_v38 }
 0x8c9   : > { %v2864_v30 = vadd.f32 %v5593_v28, %v2840_v15 }
 0x8ca   : > { %v2863_v41 = vadd.f32 %v5593_v28, %v2839_v46  ;;  %v4073_v0 = vpop.f32.mrb[86].mxu0  ;;  %4326 = vmatpush3.bf16.msra.mxu0 %v4325_v29 }
 0x8cb   : > { %2880 = vst.msk [vmem:[%s5602_s24 + $0x28] sm:$0xff] %vm735_vm1, %v2864_v30  ;;  %v2842_v39 = vadd.f32 %v4073_v0, %v2664_v6  ;;  %v2786_v55 = vpop.f32.mrb[87].mxu0  ;;  %4327 = vmatprep.subr.bf16.mxu0 %v4505_v10 }
 0x8cc   : > { %2879 = vst.msk [vmem:[%s5602_s24 + $0x20] sm:$0xff] %vm735_vm1, %v2863_v41  ;;  %v4328_v34 = vpack.c.bf16 %v2864_v30, %v2863_v41  ;;  %v2841_v14 = vadd.f32 %v2786_v55, %v2663_v20 }
 0x8cd   : > { %v2866_v33 = vadd.f32 %v5593_v28, %v2842_v39 }
 0x8ce   : > { %v2865_v16 = vadd.f32 %v5593_v28, %v2841_v14  ;;  %v4076_v27 = vpop.f32.mrb[88].mxu0  ;;  %4329 = vmatpush3.bf16.msra.mxu0 %v4328_v34 }
 0x8cf   : > { %2882 = vst.msk [vmem:[%s5602_s24 + $0x38] sm:$0xff] %vm735_vm1, %v2866_v33  ;;  %v2844_v59 = vadd.f32 %v4076_v27, %v2666_v32  ;;  %v2796_v25 = vpop.f32.mrb[89].mxu0  ;;  %4330 = vmatprep.subr.bf16.mxu0 %v4505_v10 }
 0x8d0   : > { %2881 = vst.msk [vmem:[%s5602_s24 + $0x30] sm:$0xff] %vm735_vm1, %v2865_v16  ;;  %v4331_v9 = vpack.c.bf16 %v2866_v33, %v2865_v16  ;;  %v2843_v19 = vadd.f32 %v2796_v25, %v2665_v18 }
 0x8d1   : > { %v2868_v40 = vadd.f32 %v5593_v28, %v2844_v59 }
 0x8d2   : > { %v2867_v45 = vadd.f32 %v5593_v28, %v2843_v19  ;;  %v4079_v8 = vpop.f32.mrb[90].mxu0  ;;  %4332 = vmatpush3.bf16.msra.mxu0 %v4331_v9 }
 0x8d3   : > { %2884 = vst.msk [vmem:[%s5602_s24 + $0x48] sm:$0xff] %vm735_vm1, %v2868_v40  ;;  %v2846_v36 = vadd.f32 %v4079_v8, %v2668_v50  ;;  %v2806_v4 = vpop.f32.mrb[91].mxu0  ;;  %4333 = vmatprep.subr.bf16.mxu0 %v4505_v10 }
 0x8d4   : > { %2883 = vst.msk [vmem:[%s5602_s24 + $0x40] sm:$0xff] %vm735_vm1, %v2867_v45  ;;  %v4334_v23 = vpack.c.bf16 %v2868_v40, %v2867_v45  ;;  %v2845_v7 = vadd.f32 %v2806_v4, %v2667_v26 }
 0x8d5   : > { %v2870_v47 = vadd.f32 %v5593_v28, %v2846_v36 }
 0x8d6   : > { %v2869_v13 = vadd.f32 %v5593_v28, %v2845_v7  ;;  %v4082_v22 = vpop.f32.mrb[92].mxu0  ;;  %4335 = vmatpush3.bf16.msra.mxu0 %v4334_v23 }
 0x8d7   : > { %2886 = vst.msk [vmem:[%s5602_s24 + $0x58] sm:$0xff] %vm735_vm1, %v2870_v47  ;;  %v2848_v3 = vadd.f32 %v4082_v22, %v2670_v60  ;;  %v2816_v21 = vpop.f32.mrb[93].mxu0  ;;  %4336 = vmatprep.subr.bf16.mxu0 %v4505_v10 }
 0x8d8   : > { %2885 = vst.msk [vmem:[%s5602_s24 + $0x50] sm:$0xff] %vm735_vm1, %v2869_v13  ;;  %v4337_v62 = vpack.c.bf16 %v2870_v47, %v2869_v13  ;;  %v2847_v37 = vadd.f32 %v2816_v21, %v2669_v24 }
 0x8d9   : > { %v2872_v54 = vadd.f32 %v5593_v28, %v2848_v3 }
 0x8da   : > { %v2871_v2 = vadd.f32 %v5593_v28, %v2847_v37  ;;  %v4085_v5 = vpop.f32.mrb[94].mxu0  ;;  %4338 = vmatpush3.bf16.msra.mxu0 %v4337_v62 }
 0x8db   : > { %2888 = vst.msk [vmem:[%s5602_s24 + $0x68] sm:$0xff] %vm735_vm1, %v2872_v54  ;;  %v2850_v11 = vadd.f32 %v4085_v5, %v2672_v35  ;;  %v2826_v51 = vpop.f32.mrb[95].mxu0  ;;  %4339 = vmatprep.subr.bf16.mxu0 %v4505_v10 }
 0x8dc   : > { %2887 = vst.msk [vmem:[%s5602_s24 + $0x60] sm:$0xff] %vm735_vm1, %v2871_v2  ;;  %v4340_v42 = vpack.c.bf16 %v2872_v54, %v2871_v2  ;;  %v2849_v61 = vadd.f32 %v2826_v51, %v2671_v44 }
 0x8dd   : > { %v2874_v12 = vadd.f32 %v5593_v28, %v2850_v11 }
 0x8de   : > { %v2873_v57 = vadd.f32 %v5593_v28, %v2849_v61  ;;  %4341 = vmatpush3.bf16.msra.mxu0 %v4340_v42 }
 0x8df   : > { %2890 = vst.msk [vmem:[%s5602_s24 + $0x78] sm:$0xff] %vm735_vm1, %v2874_v12  ;;  %4342 = vmatprep.subr.bf16.mxu0 %v4505_v10 }
 0x8e0   : > { %2889 = vst.msk [vmem:[%s5602_s24 + $0x70] sm:$0xff] %vm735_vm1, %v2873_v57  ;;  %v4343_v52 = vpack.c.bf16 %v2874_v12, %v2873_v57  ;;  %s2969_s24 = scalar_lea.sflag [#allocation5], %s470_s21 }
 0x8e2   : > { %4344 = vmatpush3.bf16.msra.mxu0 %v4343_v52 }
 0x8e5   : > { %4119 = vmatmul.mubr.f32.vlgmr.msra.gmra.mrb[96].mxu0 %v2891_v17 }
 0x9b8   : > { %v2958_v10 = vpop.f32.mrb[96].mxu0 }
 0x9b9   : > { %2962 = vst.msk [vmem:[%s472_s16] sm:$0xff] %vm735_vm1, %v2958_v10  ;;  %v4120_v28 = vpop.f32.mrb[97].mxu0 }
 0x9ba   : > { %4444 = shalt.err (!%p4441_p8)
}
 0x9bb   : > { %s4445_s21 = scalar_lea.hbm %s5695_s15, 128  ;;  %s4449_s22 = scalar_lea.hbm %s5751_s13, 512 }
 0x9bc   : > { %p4446_p11 = scmp.ne.s32.totalorder %s5695_s15, %s4445_s21  ;;  %p4450_p0 = scmp.lt.u32.totalorder %s5695_s15, %s5751_s13 }
 0x9bd   : > { %p4451_p5 = scmp.lt.u32.totalorder %s4449_s22, %s4445_s21  ;;  %p4453_p9 = scmp.lt.u32.totalorder %s4445_s21, %s5695_s15 }
 0x9be   : > { %p4447_p13 = pnand %p4446_p11, %p5890_p10 }
 0x9bf   : > { %p4452_p6 = por %p4451_p5, %p4450_p0 }
 0x9c0   : > { %p4448_p1 = pneg %p4447_p13 }
 0x9c1   : > { %p4454_p12 = por %p4453_p9, %p4452_p6 }
 0x9c3   : > { %p4455_p2 = pnand %p4454_p12, %p4448_p1 }
 0x9c5   : > { %4458 = shalt.err (!%p4455_p2)
}
 0x9c6   : > { %4350 = dma.vmem_to_hbm [thread:$0]  (%p5890_p10), %s5697_s17, 128, %s5695_s15, %s2969_s24  }
 0x9c7 PF: > { %p4362_p3 = scmp.ge.s32.totalorder %s4497_s28, 2  ;;  %s3006_s27 = sand.u32 1, %s4485_s25  }
 0x9c8   : > { %p5891_p4 = scmp.ne.s32.totalorder %s5823_s19, 0  ;;  %s3007_s14 = scalar_lea.sflag [#allocation5], %s3006_s27 }
 0x9ca   : > { %p4357_p7 = pnand %p4362_p3, %p5891_p4 }
 0x9cc   : > { %4480 = dma.done.wait (!%p4357_p7), %s3007_s14, 128  }
 0x9cd   : > { %4482 = vsyncadd (!%p4357_p7), %s3007_s14, 4294967168  ;;  %s5892_s28 = sld [smem:[#allocation10_spill]]  ;;  %s5893_s20 = sld [smem:[#allocation9_spill]] }
 0x9ce   : > { %s5894_s27 = sld [smem:[#allocation11_spill]]  ;;  %s5895_s25 = smov %s4489_s26 }
 0x9d3   : > { %p25_p8 = scmp.ge.s32.totalorder %s5892_s28, 6   ;;  %s5896_s26 = smov %s5893_s20 }
 0x9d5   :  { %27 = sbr.rel (!%p25_p8) target bundleno = 4 (0x4), region = 128 }
 0x9dc   :  { %3012 = vsyncpa [#allocation4], 1 }
 0x9dd   :  { %3014 = vsyncpa [#allocation4 + $0x1], 1 }
 0x9de   :  { %3015 = vsyncpa [#allocation5], 1 }
 0x9df   :  { %3017 = vsyncpa [#allocation5 + $0x1], 1 }

</bundles_post_ra>
